<compile_context>
chip_gen: v7x
topology: tpu7x:2x2x1
jax: 0.10.0
libtpu: 0.0.40
codegen_flags: <defaults>
</compile_context>

<pallas_src>
import functools

import jax
import jax.numpy as jnp
from jax.experimental import pallas as pl
from jax.experimental.pallas import tpu as pltpu


# ------------------------------ Fused kernel ---------------------------------
# Per-point MLP (Conv1d k=1 x4, eval-mode BN folded, ReLU) + online pooling
# over the points axis + post-pool MLP, all in one pallas_call.
# Grid = (B, n_tiles); batch axis "parallel", points axis "arbitrary".

def _pointnet_kernel(pooling, n_true, tn, apply_mask, use_bf16,
                     x_ref, w1, b1, w2, b2, w3, b3, w4, b4, w5, b5, w6, b6,
                     o_ref, acc_ref):
    nj = pl.program_id(1)
    last = pl.num_programs(1) - 1

    @pl.when(nj == 0)
    def _():
        init = -jnp.inf if pooling == "max" else 0.0
        acc_ref[...] = jnp.full_like(acc_ref, init)

    x = x_ref[0]                                          # (TN, 2)

    # Layer 1 (K=2): two broadcast FMAs on the VPU; keep the MXU for 2-4.
    h = x[:, 0:1] * w1[0:1, :] + x[:, 1:2] * w1[1:2, :] + b1[...]
    h = jnp.maximum(h, 0.0)                               # (TN, 64)

    def mm(lhs, w_ref):
        if use_bf16:  # static flag: bf16 operands, f32 accumulation
            lhs = lhs.astype(jnp.bfloat16)
        return jnp.dot(lhs, w_ref[...], preferred_element_type=jnp.float32)

    h = jnp.maximum(mm(h, w2) + b2[...], 0.0)             # (TN, 64)
    h = jnp.maximum(mm(h, w3) + b3[...], 0.0)             # (TN, 128)

    y = mm(h, w4)                                         # (TN, 1024), f32
    if pooling == "avg":
        # ReLU does not commute with the sum -> apply bias+ReLU per row.
        y = jnp.maximum(y + b4[...], 0.0)
    # (max pooling: bias+ReLU hoisted to the finalize below.)

    def chunk_reduce(vals):
        # (tn, C) -> (8, C): balanced tree of vreg-aligned elementwise ops
        # over 8-row chunks (no cross-sublane XLU work in the inner loop).
        op = jnp.maximum if pooling == "max" else jnp.add
        chunks = [vals[i * 8:(i + 1) * 8, :] for i in range(tn // 8)]
        while len(chunks) > 1:
            nxt = [op(chunks[i], chunks[i + 1])
                   for i in range(0, len(chunks) - 1, 2)]
            if len(chunks) % 2:
                nxt.append(chunks[-1])
            chunks = nxt
        return chunks[0]

    def accumulate(vals):
        part = chunk_reduce(vals)                          # (8, 1024)
        if pooling == "max":
            acc_ref[...] = jnp.maximum(acc_ref[...], part)
        else:
            acc_ref[...] = acc_ref[...] + part

    if apply_mask:  # static: only compiled when N was padded to N_pad
        # Only the last tile contains padded rows -> mask work gated to it.
        @pl.when(nj < last)
        def _():
            accumulate(y)

        @pl.when(nj == last)
        def _():
            row = tn * nj + jax.lax.broadcasted_iota(jnp.int32, (tn, 1), 0)
            fill = -jnp.inf if pooling == "max" else 0.0
            accumulate(jnp.where(row < n_true, y, fill))
    else:
        accumulate(y)

    @pl.when(nj == last)
    def _():
        if pooling == "max":
            pooled = jnp.max(acc_ref[...], axis=0, keepdims=True)   # (1, 1024)
            pooled = jnp.maximum(pooled + b4[...], 0.0)             # hoisted bias+ReLU
        else:
            pooled = jnp.sum(acc_ref[...], axis=0, keepdims=True) * (1.0 / n_true)
        # Fused post-pool MLP: (1,1024)@(1024,Fp) -> ReLU -> @(Fp,Fp) + b
        g = jnp.dot(pooled, w5[...], preferred_element_type=jnp.float32) + b5[...]
        g = jnp.maximum(g, 0.0)
        o_ref[0] = jnp.dot(g, w6[...], preferred_element_type=jnp.float32) + b6[...]


# -------------------------------- Wrapper -------------------------------------

def pointnet_encoder(pts, folded_params, pooling="max", precision="bf16"):
    """pts: (B, N, 2) float32.  Returns (B, 1, feat_dims) float32."""
    B, N, cin = pts.shape
    assert cin == 2 and pooling in ("max", "avg") and precision in ("f32", "bf16")
    (w1, b1), (w2, b2), (w3, b3), (w4, b4), (w5, b5), (w6, b6) = folded_params
    C4 = w4.shape[1]              # 1024
    F = w6.shape[1]               # feat_dims

    # ---- tile the points axis: target TN=512 for big N, balanced otherwise.
    n_tiles = max(1, -(-N // 512))
    TN = (-(-N // n_tiles) + 7) // 8 * 8          # sublane-aligned tile
    N_pad = n_tiles * TN
    x = pts if N_pad == N else jnp.pad(pts, ((0, 0), (0, N_pad - N), (0, 0)))
    apply_mask = N_pad != N

    # ---- precision: bf16 operands for the MXU layers 2-4 (f32 accumulation).
    use_bf16 = precision == "bf16"
    wdt = jnp.bfloat16 if use_bf16 else jnp.float32
    w2k, w3k, w4k = (w.astype(wdt) for w in (w2, w3, w4))

    # ---- pad feat dim to lane-dense 128 so stage-2 matmuls/stores are dense.
    F_pad = -(-F // 128) * 128
    w5p = jnp.pad(w5, ((0, 0), (0, F_pad - F)))
    b5p = jnp.pad(b5, ((0, 0), (0, F_pad - F)))
    w6p = jnp.pad(w6, ((0, F_pad - F), (0, F_pad - F)))
    b6p = jnp.pad(b6, ((0, 0), (0, F_pad - F)))

    params = [w1, b1, w2k, b2, w3k, b3, w4k, b4, w5p, b5p, w6p, b6p]

    def full_spec(a):
        nd = a.ndim
        # Constant block index -> Pallas does not re-DMA the weights per step.
        return pl.BlockSpec(a.shape, lambda b, nj, _nd=nd: (0,) * _nd)

    # NOTE: the (1, TN, 2) x block is lane-sparse; the kernel is strongly
    # compute-bound so the strided DMA stays hidden (see review, low priority).
    in_specs = [pl.BlockSpec((1, TN, cin), lambda b, nj: (b, nj, 0))]
    in_specs += [full_spec(p) for p in params]
    out_spec = pl.BlockSpec((1, 1, F_pad), lambda b, nj: (b, 0, 0))

    kernel = functools.partial(_pointnet_kernel, pooling, N, TN, apply_mask,
                               use_bf16)

    out = pl.pallas_call(
        kernel,
        out_shape=jax.ShapeDtypeStruct((B, 1, F_pad), jnp.float32),
        grid_spec=pltpu.PrefetchScalarGridSpec(
            num_scalar_prefetch=0,
            grid=(B, n_tiles),
            in_specs=in_specs,
            out_specs=out_spec,
            scratch_shapes=[pltpu.VMEM((8, C4), jnp.float32)],
        ),
        compiler_params=pltpu.CompilerParams(
            dimension_semantics=("parallel", "arbitrary"),
            vmem_limit_bytes=32 * 1024 * 1024),
    )(x, *params)

    return out[:, :, :F]                           # (B, 1, feat_dims)


# --------------------- Parameter init + BN folding ---------------------------

def _fold_conv_bn(w, b, gamma, beta, mean, var, eps=1e-5):
    """Conv1d(k=1) weight (out, in) + bias (out,) folded with eval-mode BN.
    Returns W' (in, out), b' (1, out) such that y = x @ W' + b'."""
    scale = gamma / jnp.sqrt(var + eps)
    w_f = (w * scale[:, None]).T
    b_f = (b - mean) * scale + beta
    return w_f.astype(jnp.float32), b_f.reshape(1, -1).astype(jnp.float32)


def _plain(w, b):
    return w.T.astype(jnp.float32), b.reshape(1, -1).astype(jnp.float32)


def make_params(key, feat_dims):
    ks = jax.random.split(key, 32)
    i = iter(range(32))

    def conv(cout, cin):
        w = 0.1 * jax.random.normal(ks[next(i)], (cout, cin), jnp.float32)
        b = 0.05 * jax.random.normal(ks[next(i)], (cout,), jnp.float32)
        return w, b

    def bn(c):
        gamma = 0.5 + jax.random.uniform(ks[next(i)], (c,), jnp.float32)
        beta = 0.1 * jax.random.normal(ks[next(i)], (c,), jnp.float32)
        mean = 0.1 * jax.random.normal(ks[next(i)], (c,), jnp.float32)
        var = 0.5 + jax.random.uniform(ks[next(i)], (c,), jnp.float32)
        return gamma, beta, mean, var

    c1w, c1b = conv(64, 2)
    c2w, c2b = conv(64, 64)
    c3w, c3b = conv(128, 64)
    c4w, c4b = conv(1024, 128)
    m1w, m1b = conv(feat_dims, 1024)
    m2w, m2b = conv(feat_dims, feat_dims)
    bn1 = bn(64)
    bn2 = bn(128)
    bn3 = bn(1024)

    folded = (
        _fold_conv_bn(c1w, c1b, *bn1),   # conv1 + bn1
        _fold_conv_bn(c2w, c2b, *bn1),   # conv2 + bn1 (same bn, as in PyTorch)
        _fold_conv_bn(c3w, c3b, *bn2),   # conv3 + bn2
        _fold_conv_bn(c4w, c4b, *bn3),   # conv4 + bn3
        _plain(m1w, m1b),                # mlp[0]
        _plain(m2w, m2b),                # mlp[2]
    )
    return folded


# ----------------------------- Reference -------------------------------------

def reference(pts, folded_params, pooling="max"):
    (w1, b1), (w2, b2), (w3, b3), (w4, b4), (w5, b5), (w6, b6) = folded_params
    h = pts
    for (w, b) in ((w1, b1), (w2, b2), (w3, b3), (w4, b4)):
        h = jnp.maximum(jnp.einsum("bnc,cd->bnd", h, w) + b, 0.0)
    if pooling == "max":
        pooled = jnp.max(h, axis=1, keepdims=True)
    else:
        pooled = jnp.mean(h, axis=1, keepdims=True)
    g = jnp.maximum(jnp.einsum("bnc,cd->bnd", pooled, w5) + b5, 0.0)
    g = jnp.einsum("bnc,cd->bnd", g, w6) + b6
    return g


# ------------------------------- Main -----------------------------------------

if __name__ == "__main__":
    key = jax.random.PRNGKey(0)
    k1, k2, k3, k_par = jax.random.split(key, 4)

    FEAT = 32
    params = make_params(k_par, FEAT)

    # small shape consistent with the module (batch=2, 16 points, 2-D points),
    # plus shapes exercising the tail mask and multi-tile (2-tile) paths.
    tests = (
        jax.random.normal(k1, (2, 16, 2), jnp.float32),    # single tile, no mask
        jax.random.normal(k2, (2, 300, 2), jnp.float32),   # single tile + tail mask
        jax.random.normal(k3, (2, 600, 2), jnp.float32),   # 2 tiles + tail mask
    )

    for pts in tests:
        for pooling in ("max", "avg"):
            ref = reference(pts, params, pooling)
            for precision, tol in (("f32", 2e-4), ("bf16", 5e-2)):
                out = jax.block_until_ready(
                    pointnet_encoder(pts, params, pooling, precision))
                assert out.shape == (pts.shape[0], 1, FEAT), out.shape
                err = float(jnp.max(jnp.abs(out - ref)))
                assert jnp.allclose(out, ref, atol=tol, rtol=tol), (
                    pts.shape, pooling, precision, err)

    print("KERNEL_OK")
</pallas_src>

<mosaic_0001>
module attributes {stable_mosaic.version = 11 : i64} {
  func.func @_pointnet_kernel(%arg0: i32, %arg1: i32, %arg2: memref<1x16x2xf32, #tpu.memory_space<vmem>>, %arg3: memref<2x64xf32, #tpu.memory_space<vmem>>, %arg4: memref<1x64xf32, #tpu.memory_space<vmem>>, %arg5: memref<64x64xf32, #tpu.memory_space<vmem>>, %arg6: memref<1x64xf32, #tpu.memory_space<vmem>>, %arg7: memref<64x128xf32, #tpu.memory_space<vmem>>, %arg8: memref<1x128xf32, #tpu.memory_space<vmem>>, %arg9: memref<128x1024xf32, #tpu.memory_space<vmem>>, %arg10: memref<1x1024xf32, #tpu.memory_space<vmem>>, %arg11: memref<1024x128xf32, #tpu.memory_space<vmem>>, %arg12: memref<1x128xf32, #tpu.memory_space<vmem>>, %arg13: memref<128x128xf32, #tpu.memory_space<vmem>>, %arg14: memref<1x128xf32, #tpu.memory_space<vmem>>, %arg15: memref<1x1x128xf32, #tpu.memory_space<vmem>>, %arg16: memref<8x1024xf32, #tpu.memory_space<vmem>>) attributes {dimension_semantics = [#tpu.dimension_semantics<parallel>, #tpu.dimension_semantics<arbitrary>], iteration_bounds = array<i64: 2, 1>, scalar_prefetch = 0 : i64, scratch_operands = 1 : i64, tpu.core_type = #tpu.core_type<tc>, window_params = [{transform_indices = @transform_0, window_bounds = array<i64: 1, 16, 2>}, {pipeline_mode = #tpu.pipeline_mode<synchronous>, transform_indices = @transform_1, window_bounds = array<i64: 2, 64>}, {pipeline_mode = #tpu.pipeline_mode<synchronous>, transform_indices = @transform_2, window_bounds = array<i64: 1, 64>}, {pipeline_mode = #tpu.pipeline_mode<synchronous>, transform_indices = @transform_3, window_bounds = array<i64: 64, 64>}, {pipeline_mode = #tpu.pipeline_mode<synchronous>, transform_indices = @transform_4, window_bounds = array<i64: 1, 64>}, {pipeline_mode = #tpu.pipeline_mode<synchronous>, transform_indices = @transform_5, window_bounds = array<i64: 64, 128>}, {pipeline_mode = #tpu.pipeline_mode<synchronous>, transform_indices = @transform_6, window_bounds = array<i64: 1, 128>}, {pipeline_mode = #tpu.pipeline_mode<synchronous>, transform_indices = @transform_7, window_bounds = array<i64: 128, 1024>}, {pipeline_mode = #tpu.pipeline_mode<synchronous>, transform_indices = @transform_8, window_bounds = array<i64: 1, 1024>}, {pipeline_mode = #tpu.pipeline_mode<synchronous>, transform_indices = @transform_9, window_bounds = array<i64: 1024, 128>}, {pipeline_mode = #tpu.pipeline_mode<synchronous>, transform_indices = @transform_10, window_bounds = array<i64: 1, 128>}, {pipeline_mode = #tpu.pipeline_mode<synchronous>, transform_indices = @transform_11, window_bounds = array<i64: 128, 128>}, {pipeline_mode = #tpu.pipeline_mode<synchronous>, transform_indices = @transform_12, window_bounds = array<i64: 1, 128>}, {transform_indices = @transform_13, window_bounds = array<i64: 1, 1, 128>}]} {
    %c0_i32 = arith.constant 0 : i32
    %0 = arith.cmpi eq, %arg1, %c0_i32 : i32
    %1 = arith.extui %0 : i1 to i32
    %c0_i32_0 = arith.constant 0 : i32
    %2 = arith.cmpi ne, %1, %c0_i32_0 : i32
    scf.if %2 {
      %cst_29 = arith.constant 0xFF800000 : f32
      %46 = vector.broadcast %cst_29 : f32 to vector<8x1024xf32>
      %c0_30 = arith.constant 0 : index
      %c0_31 = arith.constant 0 : index
      %47 = vector.load %arg16[%c0_30, %c0_31] : memref<8x1024xf32, #tpu.memory_space<vmem>>, vector<8x1024xf32>
      tpu.vector_store %arg16[%c0_30, %c0_31], %46 {strides = array<i32>} : memref<8x1024xf32, #tpu.memory_space<vmem>>, vector<8x1024xf32>,
    } else {
    }
    %c0 = arith.constant 0 : index
    %c0_1 = arith.constant 0 : index
    %c0_2 = arith.constant 0 : index
    %3 = vector.load %arg2[%c0, %c0_1, %c0_2] : memref<1x16x2xf32, #tpu.memory_space<vmem>>, vector<1x16x2xf32>
    %4 = vector.shape_cast %3 : vector<1x16x2xf32> to vector<16x2xf32>
    %5 = vector.extract_strided_slice %4 {offsets = [0, 0], sizes = [16, 1], strides = [1, 1]} : vector<16x2xf32> to vector<16x1xf32>
    %c0_3 = arith.constant 0 : index
    %c0_4 = arith.constant 0 : index
    %6 = vector.load %arg3[%c0_3, %c0_4] : memref<2x64xf32, #tpu.memory_space<vmem>>, vector<1x64xf32>
    %7 = vector.broadcast %5 : vector<16x1xf32> to vector<16x64xf32>
    %8 = vector.broadcast %6 : vector<1x64xf32> to vector<16x64xf32>
    %9 = arith.mulf %7, %8 : vector<16x64xf32>
    %10 = vector.extract_strided_slice %4 {offsets = [0, 1], sizes = [16, 1], strides = [1, 1]} : vector<16x2xf32> to vector<16x1xf32>
    %c1 = arith.constant 1 : index
    %c0_5 = arith.constant 0 : index
    %11 = vector.load %arg3[%c1, %c0_5] : memref<2x64xf32, #tpu.memory_space<vmem>>, vector<1x64xf32>
    %12 = vector.broadcast %10 : vector<16x1xf32> to vector<16x64xf32>
    %13 = vector.broadcast %11 : vector<1x64xf32> to vector<16x64xf32>
    %14 = arith.mulf %12, %13 : vector<16x64xf32>
    %15 = arith.addf %9, %14 : vector<16x64xf32>
    %c0_6 = arith.constant 0 : index
    %c0_7 = arith.constant 0 : index
    %16 = vector.load %arg4[%c0_6, %c0_7] : memref<1x64xf32, #tpu.memory_space<vmem>>, vector<1x64xf32>
    %17 = vector.broadcast %16 : vector<1x64xf32> to vector<16x64xf32>
    %18 = arith.addf %15, %17 : vector<16x64xf32>
    %cst = arith.constant 0.000000e+00 : f32
    %19 = vector.broadcast %cst : f32 to vector<16x64xf32>
    %20 = arith.maximumf %18, %19 : vector<16x64xf32>
    %c0_8 = arith.constant 0 : index
    %c0_9 = arith.constant 0 : index
    %21 = vector.load %arg5[%c0_8, %c0_9] : memref<64x64xf32, #tpu.memory_space<vmem>>, vector<64x64xf32>
    %cst_10 = arith.constant dense<0.000000e+00> : vector<16x64xf32>
    %22 = tpu.matmul %20, %21, %cst_10 {dimension_numbers = #tpu.dot_dimension_numbers<[1], [0], [0], [1], [0, 0, 1, 1], [], []>} : vector<16x64xf32>, vector<64x64xf32>, vector<16x64xf32> -> vector<16x64xf32>
    %c0_11 = arith.constant 0 : index
    %c0_12 = arith.constant 0 : index
    %23 = vector.load %arg6[%c0_11, %c0_12] : memref<1x64xf32, #tpu.memory_space<vmem>>, vector<1x64xf32>
    %24 = vector.broadcast %23 : vector<1x64xf32> to vector<16x64xf32>
    %25 = arith.addf %22, %24 : vector<16x64xf32>
    %cst_13 = arith.constant 0.000000e+00 : f32
    %26 = vector.broadcast %cst_13 : f32 to vector<16x64xf32>
    %27 = arith.maximumf %25, %26 : vector<16x64xf32>
    %c0_14 = arith.constant 0 : index
    %c0_15 = arith.constant 0 : index
    %28 = vector.load %arg7[%c0_14, %c0_15] : memref<64x128xf32, #tpu.memory_space<vmem>>, vector<64x128xf32>
    %cst_16 = arith.constant dense<0.000000e+00> : vector<16x128xf32>
    %29 = tpu.matmul %27, %28, %cst_16 {dimension_numbers = #tpu.dot_dimension_numbers<[1], [0], [0], [1], [0, 0, 1, 1], [], []>} : vector<16x64xf32>, vector<64x128xf32>, vector<16x128xf32> -> vector<16x128xf32>
    %c0_17 = arith.constant 0 : index
    %c0_18 = arith.constant 0 : index
    %30 = vector.load %arg8[%c0_17, %c0_18] : memref<1x128xf32, #tpu.memory_space<vmem>>, vector<1x128xf32>
    %31 = vector.broadcast %30 : vector<1x128xf32> to vector<16x128xf32>
    %32 = arith.addf %29, %31 : vector<16x128xf32>
    %cst_19 = arith.constant 0.000000e+00 : f32
    %33 = vector.broadcast %cst_19 : f32 to vector<16x128xf32>
    %34 = arith.maximumf %32, %33 : vector<16x128xf32>
    %c0_20 = arith.constant 0 : index
    %c0_21 = arith.constant 0 : index
    %35 = vector.load %arg9[%c0_20, %c0_21] : memref<128x1024xf32, #tpu.memory_space<vmem>>, vector<128x1024xf32>
    %cst_22 = arith.constant dense<0.000000e+00> : vector<16x1024xf32>
    %36 = tpu.matmul %34, %35, %cst_22 {dimension_numbers = #tpu.dot_dimension_numbers<[1], [0], [0], [1], [0, 0, 1, 1], [], []>} : vector<16x128xf32>, vector<128x1024xf32>, vector<16x1024xf32> -> vector<16x1024xf32>
    %37 = vector.extract_strided_slice %36 {offsets = [0, 0], sizes = [8, 1024], strides = [1, 1]} : vector<16x1024xf32> to vector<8x1024xf32>
    %38 = vector.extract_strided_slice %36 {offsets = [8, 0], sizes = [8, 1024], strides = [1, 1]} : vector<16x1024xf32> to vector<8x1024xf32>
    %39 = arith.maximumf %37, %38 : vector<8x1024xf32>
    %c0_23 = arith.constant 0 : index
    %c0_24 = arith.constant 0 : index
    %40 = vector.load %arg16[%c0_23, %c0_24] : memref<8x1024xf32, #tpu.memory_space<vmem>>, vector<8x1024xf32>
    %41 = arith.maximumf %40, %39 : vector<8x1024xf32>
    %c0_25 = arith.constant 0 : index
    %c0_26 = arith.constant 0 : index
    %42 = vector.load %arg16[%c0_25, %c0_26] : memref<8x1024xf32, #tpu.memory_space<vmem>>, vector<8x1024xf32>
    tpu.vector_store %arg16[%c0_25, %c0_26], %41 {strides = array<i32>} : memref<8x1024xf32, #tpu.memory_space<vmem>>, vector<8x1024xf32>,
    %c0_i32_27 = arith.constant 0 : i32
    %43 = arith.cmpi eq, %arg1, %c0_i32_27 : i32
    %44 = arith.extui %43 : i1 to i32
    %c0_i32_28 = arith.constant 0 : i32
    %45 = arith.cmpi ne, %44, %c0_i32_28 : i32
    scf.if %45 {
      %c0_29 = arith.constant 0 : index
      %c0_30 = arith.constant 0 : index
      %46 = vector.load %arg16[%c0_29, %c0_30] : memref<8x1024xf32, #tpu.memory_space<vmem>>, vector<8x1024xf32>
      %cst_31 = arith.constant dense<0xFF800000> : vector<1024xf32>
      %47 = vector.multi_reduction <maximumf>, %46, %cst_31 [0] : vector<8x1024xf32> to vector<1024xf32>
      %48 = vector.shape_cast %47 : vector<1024xf32> to vector<1x1024xf32>
      %c0_32 = arith.constant 0 : index
      %c0_33 = arith.constant 0 : index
      %49 = vector.load %arg10[%c0_32, %c0_33] : memref<1x1024xf32, #tpu.memory_space<vmem>>, vector<1x1024xf32>
      %50 = arith.addf %48, %49 : vector<1x1024xf32>
      %cst_34 = arith.constant 0.000000e+00 : f32
      %51 = vector.broadcast %cst_34 : f32 to vector<1x1024xf32>
      %52 = arith.maximumf %50, %51 : vector<1x1024xf32>
      %c0_35 = arith.constant 0 : index
      %c0_36 = arith.constant 0 : index
      %53 = vector.load %arg11[%c0_35, %c0_36] : memref<1024x128xf32, #tpu.memory_space<vmem>>, vector<1024x128xf32>
      %cst_37 = arith.constant dense<0.000000e+00> : vector<1x128xf32>
      %54 = tpu.matmul %52, %53, %cst_37 {dimension_numbers = #tpu.dot_dimension_numbers<[1], [0], [0], [1], [0, 0, 1, 1], [], []>} : vector<1x1024xf32>, vector<1024x128xf32>, vector<1x128xf32> -> vector<1x128xf32>
      %c0_38 = arith.constant 0 : index
      %c0_39 = arith.constant 0 : index
      %55 = vector.load %arg12[%c0_38, %c0_39] : memref<1x128xf32, #tpu.memory_space<vmem>>, vector<1x128xf32>
      %56 = arith.addf %54, %55 : vector<1x128xf32>
      %cst_40 = arith.constant 0.000000e+00 : f32
      %57 = vector.broadcast %cst_40 : f32 to vector<1x128xf32>
      %58 = arith.maximumf %56, %57 : vector<1x128xf32>
      %c0_41 = arith.constant 0 : index
      %c0_42 = arith.constant 0 : index
      %59 = vector.load %arg13[%c0_41, %c0_42] : memref<128x128xf32, #tpu.memory_space<vmem>>, vector<128x128xf32>
      %cst_43 = arith.constant dense<0.000000e+00> : vector<1x128xf32>
      %60 = tpu.matmul %58, %59, %cst_43 {dimension_numbers = #tpu.dot_dimension_numbers<[1], [0], [0], [1], [0, 0, 1, 1], [], []>} : vector<1x128xf32>, vector<128x128xf32>, vector<1x128xf32> -> vector<1x128xf32>
      %c0_44 = arith.constant 0 : index
      %c0_45 = arith.constant 0 : index
      %61 = vector.load %arg14[%c0_44, %c0_45] : memref<1x128xf32, #tpu.memory_space<vmem>>, vector<1x128xf32>
      %62 = arith.addf %60, %61 : vector<1x128xf32>
      %c0_46 = arith.constant 0 : index
      %c0_47 = arith.constant 0 : index
      %c0_48 = arith.constant 0 : index
      %63 = vector.load %arg15[%c0_46, %c0_47, %c0_48] : memref<1x1x128xf32, #tpu.memory_space<vmem>>, vector<1x1x128xf32>
      %64 = vector.shape_cast %63 : vector<1x1x128xf32> to vector<1x128xf32>
      %65 = vector.shape_cast %62 : vector<1x128xf32> to vector<1x1x128xf32>
      tpu.vector_store %arg15[%c0_46, %c0_47, %c0_48], %65 {strides = array<i32>} : memref<1x1x128xf32, #tpu.memory_space<vmem>>, vector<1x1x128xf32>,
    } else {
    }
    return
  }
  func.func @transform_0(%arg0: i32, %arg1: i32) -> (i32, i32, i32) {
    %c0_i32 = arith.constant 0 : i32
    %c0_i32_0 = arith.constant 0 : i32
    return %arg0, %arg1, %c0_i32 : i32, i32, i32
  }
  func.func @transform_1(%arg0: i32, %arg1: i32) -> (i32, i32) {
    %c0_i32 = arith.constant 0 : i32
    %c0_i32_0 = arith.constant 0 : i32
    %c0_i32_1 = arith.constant 0 : i32
    return %c0_i32, %c0_i32_0 : i32, i32
  }
  func.func @transform_2(%arg0: i32, %arg1: i32) -> (i32, i32) {
    %c0_i32 = arith.constant 0 : i32
    %c0_i32_0 = arith.constant 0 : i32
    %c0_i32_1 = arith.constant 0 : i32
    return %c0_i32, %c0_i32_0 : i32, i32
  }
  func.func @transform_3(%arg0: i32, %arg1: i32) -> (i32, i32) {
    %c0_i32 = arith.constant 0 : i32
    %c0_i32_0 = arith.constant 0 : i32
    %c0_i32_1 = arith.constant 0 : i32
    return %c0_i32, %c0_i32_0 : i32, i32
  }
  func.func @transform_4(%arg0: i32, %arg1: i32) -> (i32, i32) {
    %c0_i32 = arith.constant 0 : i32
    %c0_i32_0 = arith.constant 0 : i32
    %c0_i32_1 = arith.constant 0 : i32
    return %c0_i32, %c0_i32_0 : i32, i32
  }
  func.func @transform_5(%arg0: i32, %arg1: i32) -> (i32, i32) {
    %c0_i32 = arith.constant 0 : i32
    %c0_i32_0 = arith.constant 0 : i32
    %c0_i32_1 = arith.constant 0 : i32
    return %c0_i32, %c0_i32_0 : i32, i32
  }
  func.func @transform_6(%arg0: i32, %arg1: i32) -> (i32, i32) {
    %c0_i32 = arith.constant 0 : i32
    %c0_i32_0 = arith.constant 0 : i32
    %c0_i32_1 = arith.constant 0 : i32
    return %c0_i32, %c0_i32_0 : i32, i32
  }
  func.func @transform_7(%arg0: i32, %arg1: i32) -> (i32, i32) {
    %c0_i32 = arith.constant 0 : i32
    %c0_i32_0 = arith.constant 0 : i32
    %c0_i32_1 = arith.constant 0 : i32
    return %c0_i32, %c0_i32_0 : i32, i32
  }
  func.func @transform_8(%arg0: i32, %arg1: i32) -> (i32, i32) {
    %c0_i32 = arith.constant 0 : i32
    %c0_i32_0 = arith.constant 0 : i32
    %c0_i32_1 = arith.constant 0 : i32
    return %c0_i32, %c0_i32_0 : i32, i32
  }
  func.func @transform_9(%arg0: i32, %arg1: i32) -> (i32, i32) {
    %c0_i32 = arith.constant 0 : i32
    %c0_i32_0 = arith.constant 0 : i32
    %c0_i32_1 = arith.constant 0 : i32
    return %c0_i32, %c0_i32_0 : i32, i32
  }
  func.func @transform_10(%arg0: i32, %arg1: i32) -> (i32, i32) {
    %c0_i32 = arith.constant 0 : i32
    %c0_i32_0 = arith.constant 0 : i32
    %c0_i32_1 = arith.constant 0 : i32
    return %c0_i32, %c0_i32_0 : i32, i32
  }
  func.func @transform_11(%arg0: i32, %arg1: i32) -> (i32, i32) {
    %c0_i32 = arith.constant 0 : i32
    %c0_i32_0 = arith.constant 0 : i32
    %c0_i32_1 = arith.constant 0 : i32
    return %c0_i32, %c0_i32_0 : i32, i32
  }
  func.func @transform_12(%arg0: i32, %arg1: i32) -> (i32, i32) {
    %c0_i32 = arith.constant 0 : i32
    %c0_i32_0 = arith.constant 0 : i32
    %c0_i32_1 = arith.constant 0 : i32
    return %c0_i32, %c0_i32_0 : i32, i32
  }
  func.func @transform_13(%arg0: i32, %arg1: i32) -> (i32, i32, i32) {
    %c0_i32 = arith.constant 0 : i32
    %c0_i32_0 = arith.constant 0 : i32
    %c0_i32_1 = arith.constant 0 : i32
    return %arg0, %c0_i32, %c0_i32_0 : i32, i32, i32
  }
}

</mosaic_0001>

<bundles_post_ra>
// kernel: tpu_custom_call.1
= control target key start
LH: loop header
LB: loop body
LE: loop exit
PB: predicated region body
PF: predicated region fallthrough
CT: control target
= control target key end

     0   :  { %s3364_s0 = inlined_call_operand.vmem [shape: f32[2,16,2], index: 0, kind: input, shape index: {}]   ;;  %s3365_s1 = inlined_call_operand.vmem [shape: f32[2,64], index: 1, kind: input, shape index: {}]   ;;  %s3366_s2 = inlined_call_operand.vmem [shape: f32[1,64], index: 2, kind: input, shape index: {}]   ;;  %s3367_s3 = inlined_call_operand.hbm [shape: f32[64,64], index: 3, kind: input, shape index: {}]   ;;  %s3368_s4 = inlined_call_operand.vmem [shape: f32[1,64], index: 4, kind: input, shape index: {}]   ;;  %s3369_s5 = inlined_call_operand.hbm [shape: f32[64,128], index: 5, kind: input, shape index: {}]   ;;  %s3370_s6 = inlined_call_operand.vmem [shape: f32[1,128], index: 6, kind: input, shape index: {}]   ;;  %s3371_s7 = inlined_call_operand.hbm [shape: f32[128,1024], index: 7, kind: input, shape index: {}]   ;;  %s3372_s8 = inlined_call_operand.vmem [shape: f32[1,1024], index: 8, kind: input, shape index: {}]   ;;  %s3373_s9 = inlined_call_operand.hbm [shape: f32[1024,128], index: 9, kind: input, shape index: {}]   ;;  %s3374_s10 = inlined_call_operand.vmem [shape: f32[1,128], index: 10, kind: input, shape index: {}]   ;;  %s3375_s11 = inlined_call_operand.hbm [shape: f32[128,128], index: 11, kind: input, shape index: {}]   ;;  %s3376_s12 = inlined_call_operand.vmem [shape: f32[1,128], index: 12, kind: input, shape index: {}]   ;;  %s3377_s13 = inlined_call_operand.hbm [shape: f32[2,1,128], index: 13, kind: output, shape index: {}]  }
   0x1   :  { %3394 = sst [smem:[#allocation26_spill]] %s3369_s5 }
   0x2   :  { %3395 = sst [smem:[#allocation27_spill]] %s3376_s12 }
   0x3   :  { %3396 = sst [smem:[#allocation28_spill]] %s3377_s13 }
   0x4   :  { %18 = vsyncpa [#allocation4], 0 }
   0x5   :  { %19 = vsyncpa [#allocation7], 0 }
   0x6   :  { %20 = vsyncpa [#allocation10], 0 }
   0x7   :  { %21 = vsyncpa [#allocation5], 0 }
   0x8   :  { %23 = vsyncpa [#allocation5 + $0x1], 0  ;;  %s3038_s25 = smov 0   ;;  %s3040_s26 = smov 0  }
   0x9   :  { %s3042_s27 = smov 0   ;;  %s3044_s28 = smov 0  }
   0xa   :  { %s3046_s29 = smov 0   ;;  %s3048_s30 = smov 0  }
   0xb LB: > { %3397 = sst [smem:[#allocation17_spill]] %s2931_s25  ;;  %s2010_s14 = sadd.s32 4294967295, %s2951_s30   ;;  %s2951_s30 = sphi %s3048_s30, %s29_s30   ;;  %s2947_s29 = sphi %s3046_s29, %s3429_s29   ;;  %s2943_s28 = sphi %s3044_s28, %s3428_s28   ;;  %s2939_s27 = sphi %s3042_s27, %s3427_s27   ;;  %s2935_s26 = sphi %s3040_s26, %s3426_s26   ;;  %s2931_s25 = sphi %s3038_s25, %s3425_s25  }
   0xc   : > { %3398 = sst [smem:[#allocation18_spill]] %s2935_s26  ;;  %s2011_s15 = sadd.s32 4294967294, %s2951_s30  }
   0xd   : > { %3399 = sst [smem:[#allocation19_spill]] %s2939_s27  ;;  %s41_s16 = sadd.s32 1, %s2947_s29 }
   0xe   : > { %3400 = sst [smem:[#allocation20_spill]] %s2947_s29  ;;  %s328_s17 = sadd.s32 1, %s2939_s27 }
   0xf   : > { %3401 = sst [smem:[#allocation21_spill]] %s2951_s30  ;;  %p43_p0 = scmp.ge.s32.totalorder %s41_s16, 2 }
  0x10   : > { %p338_p1 = scmp.ne.s32.totalorder %s2939_s27, %s2935_s26  ;;  %p339_p2 = scmp.eq.s32.totalorder %s2010_s14, 1 }
  0x11   : > { %p344_p3 = scmp.ne.s32.totalorder %s2935_s26, %s2931_s25  ;;  %s3431_s16 = smov (%p43_p0, %s41_s16), 0 }
  0x12   : > { %3402 = sst [smem:[#allocation22_spill]] %s3431_s16  ;;  %p3078_p4 = por %p339_p2, %p338_p1 }
  0x13   : > { %p345_p5 = scmp.eq.s32.totalorder %s2011_s15, 1  ;;  %s325_s19 = ssub.s32 %s2947_s29, %s3431_s16 }
  0x14   : > { %s3403_s18 = scalar_select %p3078_p4, 1, 0 }
  0x15   : > { %p2012_p6 = scmp.ge.s32.totalorder %s2951_s30, 1  ;;  %p326_p7 = scmp.eq.s32.totalorder %s325_s19, 0 }
  0x16   : > { %3404 = sst [smem:[#allocation23_spill]] %s3403_s18  ;;  %p3085_p8 = por %p345_p5, %p344_p3 }
  0x17   : > { %p352_p9 = scmp.lt.s32.totalorder %s2951_s30, 3  ;;  %p3097_p11 = scmp.eq.s32.totalorder %s2010_s14, 0 }
  0x18   : > { %s3405_s20 = scalar_select %p3085_p8, 1, 0 }
  0x19   : > { %s3091_s21 = scalar_select %p326_p7, %s2939_s27, %s328_s17  }
  0x1a   : > { %3406 = sst [smem:[#allocation24_spill]] %s3405_s20  ;;  %p3093_p10 = pnand %p2012_p6, %p352_p9 }
  0x1b   : > { %3407 = sst [smem:[#allocation25_spill]] %s3091_s21  ;;  %s2953_s24 = smov [#allocation6]  }
  0x1c   : > { %s3408_s22 = scalar_select %p3093_p10, 1, 0 }
  0x1d   : > { %s3409_s23 = scalar_select %p3097_p11, 1, 0 }
  0x1e   : > { %p2624_p12 = pneg %p3093_p10  ;;  %s386_s15 = sshll.u32 %s2953_s24, 4  ;;  %s387_s15 = int_to_ptr.vmem [resolvable:$true] %s386_s15 }
  0x1f   : > { %s2954_s17 = smov [#allocation9]   ;;  %s3411_s5 = sld [smem:[#allocation26_spill]] }
  0x20   : > { %p3105_p13 = pnand %p3097_p11, %p2624_p12  ;;  %s418_s16 = sshll.u32 %s2954_s17, 4  ;;  %s3109_s16 = int_to_ptr.vmem [resolvable:$true] %s418_s16 }
  0x22   : > { %p3119_p1 = pneg %p3105_p13 }
  0x25   : > { %s2721_s21 = scalar_lea.hbm %s3411_s5, 1024 }
  0x26   : > { %p2722_p0 = scmp.ne.s32.totalorder %s3411_s5, %s2721_s21  ;;  %p2728_p5 = scmp.lt.u32.totalorder %s2721_s21, %s3411_s5 }
  0x28   : > { %p2724_p2 = pnand %p3119_p1, %p2722_p0 }
  0x2a   : > { %p2725_p3 = pneg %p2724_p2 }
  0x2c   : > { %p2730_p6 = pnand %p2728_p5, %p2725_p3 }
  0x2e   : > { %2733 = shalt.err (!%p2730_p6)
}
  0x2f   : > { %s2734_s29 = scalar_lea.vmem %s387_s15, 1024  ;;  %p2742_p8 = scmp.lt.s32.totalorder %s387_s15, %s387_s15 }
  0x30   : > { %p2735_p7 = scmp.ne.s32.totalorder %s387_s15, %s2734_s29  ;;  %p2743_p4 = scmp.lt.s32.totalorder %s2734_s29, %s2734_s29 }
  0x32   : > { %p2737_p9 = pnand %p2735_p7, %p3119_p1  ;;  %p2744_p11 = por %p2743_p4, %p2742_p8 }
  0x34   : > { %p2738_p12 = pneg %p2737_p9 }
  0x36   : > { %p2745_p10 = pnand %p2744_p11, %p2738_p12 }
  0x38   : > { %2748 = shalt.err (!%p2745_p10)
}
  0x39   : > { %s3393_s27 = smov 128   ;;  %s2956_s20 = smov 8  }
  0x3a   : > { %2630 = dma.hbm_to_vmem [thread:$0]  (!%p3105_p13), %s3411_s5, 1024, %s387_s15, [#allocation7], %s3393_s27, %s3393_s27, %s2956_s20  }
  0x3b   : > { %s2749_s30 = scalar_lea.hbm %s3373_s9, 16384 }
  0x3c   : > { %p2750_p4 = scmp.ne.s32.totalorder %s3373_s9, %s2749_s30  ;;  %p2756_p11 = scmp.lt.u32.totalorder %s2749_s30, %s3373_s9 }
  0x3e   : > { %p2752_p8 = pnand %p2750_p4, %p3119_p1 }
  0x40   : > { %p2753_p10 = pneg %p2752_p8 }
  0x42   : > { %p2758_p0 = pnand %p2756_p11, %p2753_p10 }
  0x44   : > { %2761 = shalt.err (!%p2758_p0)
}
  0x45   : > { %s2762_s15 = scalar_lea.vmem %s3109_s16, 16384  ;;  %p2770_p6 = scmp.lt.s32.totalorder %s3109_s16, %s3109_s16 }
  0x46   : > { %p2763_p2 = scmp.ne.s32.totalorder %s3109_s16, %s2762_s15  ;;  %p2771_p7 = scmp.lt.s32.totalorder %s2762_s15, %s2762_s15 }
  0x48   : > { %p2765_p3 = pnand %p2763_p2, %p3119_p1  ;;  %p2772_p9 = por %p2771_p7, %p2770_p6 }
  0x4a   : > { %p2766_p5 = pneg %p2765_p3 }
  0x4c   : > { %p2773_p12 = pnand %p2772_p9, %p2766_p5 }
  0x4e   : > { %2776 = shalt.err (!%p2773_p12)
}
  0x4f   : > { %2636 = dma.hbm_to_vmem [thread:$0]  (!%p3105_p13), %s3373_s9, 16384, %s3109_s16, [#allocation10], %s3393_s27, %s3393_s27, %s2956_s20  }
  0x50   : > { %s2957_s30 = smov [#allocation3]   ;;  %s2958_s25 = smov [#allocation8]  }
  0x51   : > { %s370_s18 = sshll.u32 %s2957_s30, 4  ;;  %s402_s21 = sshll.u32 %s2958_s25, 4  ;;  %s371_s18 = int_to_ptr.vmem [resolvable:$true] %s370_s18  ;;  %s403_s21 = int_to_ptr.vmem [resolvable:$true] %s402_s21 }
  0x52   : > { %s2777_s29 = scalar_lea.hbm %s3367_s3, 1024 }
  0x53   : > { %p2778_p4 = scmp.ne.s32.totalorder %s3367_s3, %s2777_s29  ;;  %p2784_p11 = scmp.lt.u32.totalorder %s2777_s29, %s3367_s3 }
  0x55   : > { %p2780_p8 = pnand %p2778_p4, %p3119_p1 }
  0x57   : > { %p2781_p10 = pneg %p2780_p8 }
  0x59   : > { %p2786_p0 = pnand %p2784_p11, %p2781_p10 }
  0x5b   : > { %2789 = shalt.err (!%p2786_p0)
}
  0x5c   : > { %s2790_s16 = scalar_lea.vmem %s371_s18, 1024  ;;  %p2798_p6 = scmp.lt.s32.totalorder %s371_s18, %s371_s18 }
  0x5d   : > { %p2791_p2 = scmp.ne.s32.totalorder %s371_s18, %s2790_s16  ;;  %p2799_p7 = scmp.lt.s32.totalorder %s2790_s16, %s2790_s16 }
  0x5f   : > { %p2793_p3 = pnand %p2791_p2, %p3119_p1  ;;  %p2800_p9 = por %p2799_p7, %p2798_p6 }
  0x61   : > { %p2794_p5 = pneg %p2793_p3 }
  0x63   : > { %p2801_p12 = pnand %p2800_p9, %p2794_p5 }
  0x65   : > { %2804 = shalt.err (!%p2801_p12)
}
  0x66   : > { %2627 = dma.hbm_to_vmem [thread:$0]  (!%p3105_p13), %s3367_s3, 1024, %s371_s18, [#allocation4], %s3393_s27, %s3393_s27, %s2956_s20  }
  0x67   : > { %s2805_s25 = scalar_lea.hbm %s3371_s7, 16384 }
  0x68   : > { %p2806_p4 = scmp.ne.s32.totalorder %s3371_s7, %s2805_s25  ;;  %p2812_p11 = scmp.lt.u32.totalorder %s2805_s25, %s3371_s7 }
  0x6a   : > { %p2808_p8 = pnand %p2806_p4, %p3119_p1 }
  0x6c   : > { %p2809_p10 = pneg %p2808_p8 }
  0x6e   : > { %p2814_p0 = pnand %p2812_p11, %p2809_p10 }
  0x70   : > { %2817 = shalt.err (!%p2814_p0)
}
  0x71   : > { %s2818_s12 = scalar_lea.vmem %s403_s21, 16384  ;;  %p2826_p6 = scmp.lt.s32.totalorder %s403_s21, %s403_s21 }
  0x72   : > { %p2819_p2 = scmp.ne.s32.totalorder %s403_s21, %s2818_s12  ;;  %p2827_p7 = scmp.lt.s32.totalorder %s2818_s12, %s2818_s12 }
  0x74   : > { %p2821_p3 = pnand %p2819_p2, %p3119_p1  ;;  %p2828_p9 = por %p2827_p7, %p2826_p6 }
  0x76   : > { %p2822_p5 = pneg %p2821_p3 }
  0x78   : > { %p2829_p12 = pnand %p2828_p9, %p2822_p5 }
  0x7a   : > { %2832 = shalt.err (!%p2829_p12)
}
  0x7b   : > { %s2959_s18 = smov 1024   ;;  %s2960_s16 = smov 64  }
  0x7c   : > { %2633 = dma.hbm_to_vmem [thread:$0]  (!%p3105_p13), %s3371_s7, 16384, %s403_s21, [#allocation7], %s2959_s18, %s2959_s18, %s2960_s16  }
  0x7d   : > { %s2961_s13 = smov [#allocation11]   ;;  %s2833_s17 = scalar_lea.hbm %s3375_s11, 2048 }
  0x7e   : > { %s434_s30 = sshll.u32 %s2961_s13, 4  ;;  %p2834_p4 = scmp.ne.s32.totalorder %s3375_s11, %s2833_s17  ;;  %s435_s30 = int_to_ptr.vmem [resolvable:$true] %s434_s30 }
  0x7f   : > { %p2840_p11 = scmp.lt.u32.totalorder %s2833_s17, %s3375_s11 }
  0x80   : > { %p2836_p8 = pnand %p2834_p4, %p3119_p1 }
  0x82   : > { %p2837_p10 = pneg %p2836_p8 }
  0x84   : > { %p2842_p0 = pnand %p2840_p11, %p2837_p10 }
  0x86   : > { %2845 = shalt.err (!%p2842_p0)
}
  0x87   : > { %s2846_s21 = scalar_lea.vmem %s435_s30, 2048  ;;  %p2854_p6 = scmp.lt.s32.totalorder %s435_s30, %s435_s30 }
  0x88   : > { %p2847_p2 = scmp.ne.s32.totalorder %s435_s30, %s2846_s21  ;;  %p2855_p7 = scmp.lt.s32.totalorder %s2846_s21, %s2846_s21 }
  0x8a   : > { %p2849_p3 = pnand %p2847_p2, %p3119_p1  ;;  %p2856_p9 = por %p2855_p7, %p2854_p6 }
  0x8c   : > { %p2850_p5 = pneg %p2849_p3 }
  0x8e   : > { %p2857_p12 = pnand %p2856_p9, %p2850_p5 }
  0x90   : > { %2860 = shalt.err (!%p2857_p12)
}
  0x91   : > { %s3413_s18 = smov 128   ;;  %p3414_p4 = scmp.ne.s32.totalorder %s3408_s22, 0 }
  0x92   : > { %2639 = dma.hbm_to_vmem [thread:$0]  (!%p3105_p13), %s3375_s11, 2048, %s435_s30, [#allocation10], %s3413_s18, %s3413_s18, %s2956_s20  }
  0x93   : > { %466 = sbr.rel (%p3414_p4) target bundleno = 1460 (0x5b4), region = 72  ;;  %p3415_p1 = scmp.ne.s32.totalorder (!%p3414_p4), %s3409_s23, 0 }
  0x9a   : > { %2914 = dma.done.wait (%p3415_p1), [#allocation4], 1024  }
  0x9b   : > { %2916 = vsyncadd (%p3415_p1), [#allocation4], 4294966272 }
  0x9c   : > { %2918 = dma.done.wait (%p3415_p1), [#allocation7], 17408  }
  0x9d   : > { %2920 = vsyncadd (%p3415_p1), [#allocation7], 4294949888 }
  0x9e   : > { %2922 = dma.done.wait (%p3415_p1), [#allocation10], 18432  }
  0x9f   : > { %2924 = vsyncadd (%p3415_p1), [#allocation10], 4294948864  ;;  %p530_p13 = scmp.lt.s32.totalorder %s2943_s28, 1  ;;  %v2962_v0 = vmov 0   ;;  %v598_v3 = vld [vmem:[#allocation3] sm:$0xff]  ;;  %v599_v4 = vld [vmem:[#allocation3 + $0x8] sm:$0xff] }
  0xa0   : > { %2719 = vset.pattern.permute.xlu1 %v2962_v0  ;;  %2717 = vset.pattern.permute.xlu0 %v2962_v0  ;;  %v600_v5 = vld [vmem:[#allocation3 + $0x10] sm:$0xff]  ;;  %v2290_v6 = vpack.c.bf16 %v599_v4, %v598_v3  ;;  %v601_v7 = vld [vmem:[#allocation3 + $0x18] sm:$0xff]  ;;  %v2963_v9 = vmov 1   ;;  %v602_v10 = vld [vmem:[#allocation3 + $0x20] sm:$0xff]  ;;  %vm613_vm0 = vcmask 523264   ;;  %vm2966_vm1 = vmmov 0  }
  0xa1   : > { %s531_s22 = scalar_select %p530_p13, %s2943_s28, 1  ;;  %v2294_v8 = vpack.c.bf16 %v601_v7, %v600_v5  ;;  %v603_v11 = vld [vmem:[#allocation3 + $0x28] sm:$0xff]  ;;  %v604_v13 = vld [vmem:[#allocation3 + $0x30] sm:$0xff]  ;;  %v605_v14 = vld [vmem:[#allocation3 + $0x38] sm:$0xff] }
  0xa2   : > { %2291 = vmatprep.subr.bf16.mxu1 %v2290_v6  ;;  %v2298_v12 = vpack.c.bf16 %v603_v11, %v602_v10  ;;  %v2302_v15 = vpack.c.bf16 %v605_v14, %v604_v13  ;;  %v697_v16 = vld [vmem:[#allocation6] sm:$0xff]  ;;  %v698_v17 = vld [vmem:[#allocation6 + $0x8] sm:$0xff]  ;;  %v699_v34 = vld [vmem:[#allocation6 + $0x10] sm:$0xff]  ;;  %s3418_s23 = sld [smem:[#allocation27_spill]]  ;;  %s2036_s26 = sshll.u32 %s2943_s28, 4 }
  0xa3   : > { %s2039_s19 = sshll.u32 %s531_s22, 4  ;;  %2293 = vmatpush3.bf16.msra.mxu1 %v2290_v6  ;;  %v2306_v18 = vpack.c.bf16 %v698_v17, %v697_v16  ;;  %v2027_v21 = vld [vmem:[%s3365_s1] ss:$0 sm:$0xff]  ;;  %v2028_v22 = vld [vmem:[%s3365_s1 + $0x1] ss:$0 sm:$0xff]  ;;  %v700_v35 = vld [vmem:[#allocation6 + $0x18] sm:$0xff] }
  0xa4   : > { %s537_s5 = scalar_lea.vmem %s3364_s0, %s2039_s19  ;;  %2295 = vmatprep.subr.bf16.mxu1 %v2294_v8  ;;  %v2029_v29 = vld [vmem:[%s3366_s2] ss:$0 sm:$0xff]  ;;  %v2310_v38 = vpack.c.bf16 %v700_v35, %v699_v34  ;;  %v702_v40 = vld [vmem:[#allocation6 + $0x28] sm:$0xff]  ;;  %v703_v42 = vld [vmem:[#allocation6 + $0x30] sm:$0xff]  ;;  %s3416_s22 = sld [smem:[#allocation18_spill]] }
  0xa5   : > { %v552_v1 = vld [vmem:[%s537_s5 + $0x8] sm:$0xff]  ;;  %v551_v2 = vld [vmem:[%s537_s5] sm:$0xff]  ;;  %v704_v43 = vld [vmem:[#allocation6 + $0x38] sm:$0xff]  ;;  %s3417_s19 = sld [smem:[#allocation23_spill]]  ;;  %s2967_s28 = smov [#allocation12]  }
  0xa6   : > { %561 = vperm.xlu1 %2719, %v552_v1   ;;  %556 = vperm.xlu0 %2717, %v551_v2   ;;  %v701_v39 = vld [vmem:[#allocation6 + $0x20] sm:$0xff]  ;;  %v2318_v44 = vpack.c.bf16 %v704_v43, %v703_v42  ;;  %v796_v45 = vld [vmem:[#allocation8 + $0x8] sm:$0xff]  ;;  %v798_v47 = vld [vmem:[#allocation8 + $0x18] sm:$0xff]  ;;  %s3419_s17 = sld [smem:[#allocation28_spill]]  ;;  %s2865_s21 = sshll.u32 %s2967_s28, 4  ;;  %s2866_s21 = int_to_ptr.vmem [resolvable:$false] %s2865_s21 }
  0xa7   : > { %2297 = vmatpush3.bf16.msra.mxu1 %v2294_v8  ;;  %v2314_v41 = vpack.c.bf16 %v702_v40, %v701_v39  ;;  %v804_v46 = vld [vmem:[#allocation8 + $0x48] sm:$0xff]  ;;  %v806_v49 = vld [vmem:[#allocation8 + $0x58] sm:$0xff]  ;;  %v795_v50 = vld [vmem:[#allocation8] sm:$0xff]  ;;  %s2867_s18 = scalar_lea.vmem %s2866_s21, 32 }
  0xa8   : > { %2299 = vmatprep.subr.bf16.mxu1 %v2298_v12  ;;  %v2322_v48 = vpack.c.bf16 %v804_v46, %v796_v45  ;;  %v803_v51 = vld [vmem:[#allocation8 + $0x40] sm:$0xff]  ;;  %v2354_v52 = vpack.c.bf16 %v806_v49, %v798_v47  ;;  %v812_v54 = vld [vmem:[#allocation8 + $0x88] sm:$0xff]  ;;  %v822_v34 = vld [vmem:[#allocation8 + $0xd8] sm:$0xff] }
  0xa9   : > { %v2324_v53 = vpack.c.bf16 %v803_v51, %v795_v50  ;;  %v820_v55 = vld [vmem:[#allocation8 + $0xc8] sm:$0xff]  ;;  %v811_v57 = vld [vmem:[#allocation8 + $0x80] sm:$0xff]  ;;  %v813_v39 = vld [vmem:[#allocation8 + $0x90] sm:$0xff] }
  0xaa   : > { %2720 = vset.pattern.permute.xlu1 %v2963_v9  ;;  %2718 = vset.pattern.permute.xlu0 %v2963_v9  ;;  %v2326_v56 = vpack.c.bf16 %v820_v55, %v812_v54  ;;  %v819_v58 = vld [vmem:[#allocation8 + $0xc0] sm:$0xff]  ;;  %v828_v60 = vld [vmem:[#allocation8 + $0x108] sm:$0xff]  ;;  %v821_v40 = vld [vmem:[#allocation8 + $0xd0] sm:$0xff]  ;;  %s527_s24 = sand.u32 1, %s3416_s22  }
  0xab   : > { %576 = vperm.xlu1 %2720, %v552_v1   ;;  %572 = vperm.xlu0 %2718, %v551_v2   ;;  %v2328_v59 = vpack.c.bf16 %v819_v58, %v811_v57  ;;  %v836_v61 = vld [vmem:[#allocation8 + $0x148] sm:$0xff]  ;;  %v827_v63 = vld [vmem:[#allocation8 + $0x100] sm:$0xff]  ;;  %v838_v42 = vld [vmem:[#allocation8 + $0x158] sm:$0xff]  ;;  %v2360_v43 = vpack.c.bf16 %v821_v40, %v813_v39  ;;  %s528_s13 = scalar_lea.vmem [#allocation12], %s527_s24  ;;  %s1879_s15 = scalar_lea.sflag [#allocation5], %s527_s24 }
  0xac   : > { %2301 = vmatpush3.bf16.msra.mxu1 %v2298_v12  ;;  %2323 = vmatprep.subr.bf16.mxu0 %v2322_v48  ;;  %v2330_v62 = vpack.c.bf16 %v836_v61, %v828_v60  ;;  %v835_v0 = vld [vmem:[#allocation8 + $0x140] sm:$0xff]  ;;  %v844_v2 = vld [vmem:[#allocation8 + $0x188] sm:$0xff]  ;;  %v829_v45 = vld [vmem:[#allocation8 + $0x110] sm:$0xff]  ;;  %s1891_s30 = sshll.u32 %s528_s13, 4  ;;  %s3317_s29 = scalar_lea.hbm %s3419_s17, %s2036_s26  ;;  %s3319_s30 = int_to_ptr.vmem [resolvable:$true] %s1891_s30 }
  0xad   : > { %2303 = vmatprep.subr.bf16.mxu1 %v2302_v15  ;;  %2325 = vmatpush1.bf16.msra.mxu0 %v2324_v53  ;;  %v2332_v1 = vpack.c.bf16 %v835_v0, %v827_v63  ;;  %v852_v3 = vld [vmem:[#allocation8 + $0x1c8] sm:$0xff]  ;;  %v843_v5 = vld [vmem:[#allocation8 + $0x180] sm:$0xff]  ;;  %v837_v46 = vld [vmem:[#allocation8 + $0x150] sm:$0xff]  ;;  %s2861_s12 = scalar_lea.vmem %s3319_s30, 16  ;;  %p3420_p10 = scmp.ne.s32.totalorder %s3417_s19, 0 }
  0xae   : > { %2327 = vmatprep.subr.bf16.mxu0 %v2326_v56  ;;  %v2334_v4 = vpack.c.bf16 %v852_v3, %v844_v2  ;;  %v851_v6 = vld [vmem:[#allocation8 + $0x1c0] sm:$0xff]  ;;  %v860_v8 = vld [vmem:[#allocation8 + $0x208] sm:$0xff]  ;;  %v846_v47 = vld [vmem:[#allocation8 + $0x198] sm:$0xff]  ;;  %v2364_v49 = vpack.c.bf16 %v837_v46, %v829_v45  ;;  %p2862_p8 = scmp.ne.s32.totalorder %s3319_s30, %s2861_s12  ;;  %p2868_p2 = scmp.lt.s32.totalorder %s3319_s30, %s2866_s21 }
  0xaf   : > { %v2336_v7 = vpack.c.bf16 %v851_v6, %v843_v5  ;;  %v868_v9 = vld [vmem:[#allocation8 + $0x248] sm:$0xff]  ;;  %v859_v11 = vld [vmem:[#allocation8 + $0x200] sm:$0xff]  ;;  %v854_v48 = vld [vmem:[#allocation8 + $0x1d8] sm:$0xff]  ;;  %p2869_p3 = scmp.lt.s32.totalorder %s2867_s18, %s2861_s12 }
  0xb0   : > { %2305 = vmatpush3.bf16.msra.mxu1 %v2302_v15  ;;  %v2338_v10 = vpack.c.bf16 %v868_v9, %v860_v8  ;;  %v867_v12 = vld [vmem:[#allocation8 + $0x240] sm:$0xff]  ;;  %v876_v14 = vld [vmem:[#allocation8 + $0x288] sm:$0xff]  ;;  %v2366_v50 = vpack.c.bf16 %v854_v48, %v846_v47  ;;  %v845_v51 = vld [vmem:[#allocation8 + $0x190] sm:$0xff]  ;;  %p2863_p11 = pnand %p2862_p8, %p3420_p10 }
  0xb1   : > { %2307 = vmatprep.subr.bf16.mxu1 %v2306_v18  ;;  %2329 = vmatpush1.bf16.msra.mxu0 %v2328_v59  ;;  %v2340_v13 = vpack.c.bf16 %v867_v12, %v859_v11  ;;  %v884_v15 = vld [vmem:[#allocation8 + $0x2c8] sm:$0xff]  ;;  %v875_v17 = vld [vmem:[#allocation8 + $0x280] sm:$0xff]  ;;  %v862_v53 = vld [vmem:[#allocation8 + $0x218] sm:$0xff]  ;;  %p2870_p5 = por %p2869_p3, %p2868_p2 }
  0xb2   : > { %2331 = vmatprep.subr.bf16.mxu0 %v2330_v62  ;;  %v2342_v16 = vpack.c.bf16 %v884_v15, %v876_v14  ;;  %v870_v54 = vld [vmem:[#allocation8 + $0x258] sm:$0xff]  ;;  %v861_v57 = vld [vmem:[#allocation8 + $0x210] sm:$0xff]  ;;  %v908_v8 = vld [vmem:[#allocation8 + $0x388] sm:$0xff]  ;;  %p2864_p0 = pneg %p2863_p11 }
  0xb3   : > { %v2370_v56 = vpack.c.bf16 %v870_v54, %v862_v53  ;;  %v869_v58 = vld [vmem:[#allocation8 + $0x250] sm:$0xff]  ;;  %v878_v59 = vld [vmem:[#allocation8 + $0x298] sm:$0xff]  ;;  %v916_v9 = vld [vmem:[#allocation8 + $0x3c8] sm:$0xff] }
  0xb4   : > { %v886_v60 = vld [vmem:[#allocation8 + $0x2d8] sm:$0xff]  ;;  %v2372_v61 = vpack.c.bf16 %v869_v58, %v861_v57  ;;  %v877_v63 = vld [vmem:[#allocation8 + $0x290] sm:$0xff]  ;;  %v2350_v11 = vpack.c.bf16 %v916_v9, %v908_v8  ;;  %v915_v14 = vld [vmem:[#allocation8 + $0x3c0] sm:$0xff]  ;;  %p2871_p6 = pnand %p2870_p5, %p2864_p0 }
  0xb5   : > { %2333 = vmatpush1.bf16.msra.mxu0 %v2332_v1  ;;  %v2374_v62 = vpack.c.bf16 %v886_v60, %v878_v59  ;;  %v885_v0 = vld [vmem:[#allocation8 + $0x2d0] sm:$0xff]  ;;  %v894_v1 = vld [vmem:[#allocation8 + $0x318] sm:$0xff]  ;;  %v832_v47 = vld [vmem:[#allocation8 + $0x128] sm:$0xff] }
  0xb6   : > { %2335 = vmatprep.subr.bf16.mxu0 %v2334_v4  ;;  %v902_v2 = vld [vmem:[#allocation8 + $0x358] sm:$0xff]  ;;  %v2376_v3 = vpack.c.bf16 %v885_v0, %v877_v63  ;;  %v893_v5 = vld [vmem:[#allocation8 + $0x310] sm:$0xff]  ;;  %v856_v63 = vld [vmem:[#allocation8 + $0x1e8] sm:$0xff] }
  0xb7   : > { %v2378_v4 = vpack.c.bf16 %v902_v2, %v894_v1  ;;  %v901_v6 = vld [vmem:[#allocation8 + $0x350] sm:$0xff]  ;;  %v918_v12 = vld [vmem:[#allocation8 + $0x3d8] sm:$0xff] }
  0xb8   : > { %v817_v45 = vld [vmem:[#allocation8 + $0xb0] sm:$0xff]  ;;  %v850_v0 = vld [vmem:[#allocation8 + $0x1b8] sm:$0xff] }
  0xb9   : > { %2337 = vmatpush1.bf16.msra.mxu0 %v2336_v7  ;;  %v2380_v7 = vpack.c.bf16 %v901_v6, %v893_v5  ;;  %v825_v46 = vld [vmem:[#allocation8 + $0xf0] sm:$0xff]  ;;  %v858_v1 = vld [vmem:[#allocation8 + $0x1f8] sm:$0xff]  ;;  %v855_v5 = vld [vmem:[#allocation8 + $0x1e0] sm:$0xff] }
  0xba   : > { %2339 = vmatprep.subr.bf16.mxu0 %v2338_v10  ;;  %v910_v10 = vld [vmem:[#allocation8 + $0x398] sm:$0xff]  ;;  %v2424_v54 = vpack.c.bf16 %v825_v46, %v817_v45  ;;  %v833_v60 = vld [vmem:[#allocation8 + $0x130] sm:$0xff] }
  0xbb   : > { %v2382_v15 = vpack.c.bf16 %v918_v12, %v910_v10  ;;  %v849_v8 = vld [vmem:[#allocation8 + $0x1b0] sm:$0xff]  ;;  %v864_v10 = vld [vmem:[#allocation8 + $0x228] sm:$0xff]  ;;  %v866_v12 = vld [vmem:[#allocation8 + $0x238] sm:$0xff] }
  0xbc   : > { %v857_v9 = vld [vmem:[#allocation8 + $0x1f0] sm:$0xff] }
  0xbd   : > { %2341 = vmatpush1.bf16.msra.mxu0 %v2340_v13  ;;  %v907_v13 = vld [vmem:[#allocation8 + $0x380] sm:$0xff]  ;;  %v897_v46 = vld [vmem:[#allocation8 + $0x330] sm:$0xff] }
  0xbe   : > { %2343 = vmatprep.subr.bf16.mxu0 %v2342_v16  ;;  %v2352_v16 = vpack.c.bf16 %v915_v14, %v907_v13  ;;  %v874_v13 = vld [vmem:[#allocation8 + $0x278] sm:$0xff] }
 0x125   : > { %v557_v19 = vpop.permute.xlu0 %556  ;;  %v562_v20 = vpop.permute.xlu1 %561 }
 0x126   : > { %v568_v25 = vmul.f32 %v2027_v21, %v557_v19  ;;  %v569_v26 = vmul.f32 %v2027_v21, %v562_v20  ;;  %v892_v20 = vld [vmem:[#allocation8 + $0x308] sm:$0xff] }
 0x127   : > { %v900_v21 = vld [vmem:[#allocation8 + $0x348] sm:$0xff] }
 0x12a   : > { %v577_v23 = vpop.permute.xlu1 %576  ;;  %v573_v24 = vpop.permute.xlu0 %572 }
 0x12b   : > { %v584_v27 = vmul.f32 %v2028_v22, %v577_v23  ;;  %v583_v28 = vmul.f32 %v2028_v22, %v573_v24  ;;  %v2346_v22 = vpack.c.bf16 %v900_v21, %v892_v20  ;;  %v891_v23 = vld [vmem:[#allocation8 + $0x300] sm:$0xff]  ;;  %v800_v20 = vld [vmem:[#allocation8 + $0x28] sm:$0xff] }
 0x12c   : > { %v899_v24 = vld [vmem:[#allocation8 + $0x340] sm:$0xff]  ;;  %v808_v21 = vld [vmem:[#allocation8 + $0x68] sm:$0xff] }
 0x12d   : > { %v586_v30 = vadd.f32 %v584_v27, %v569_v26  ;;  %v585_v31 = vadd.f32 %v583_v28, %v568_v25  ;;  %v2348_v25 = vpack.c.bf16 %v899_v24, %v891_v23  ;;  %v2030_v26 = vld [vmem:[%s3368_s4] ss:$0 sm:$0xff]  ;;  %v2386_v23 = vpack.c.bf16 %v808_v21, %v800_v20  ;;  %v810_v24 = vld [vmem:[#allocation8 + $0x78] sm:$0xff]  ;;  %v865_v20 = vld [vmem:[#allocation8 + $0x230] sm:$0xff] }
 0x12e   : > { %v873_v21 = vld [vmem:[#allocation8 + $0x270] sm:$0xff] }
 0x12f   : > { %v594_v32 = vadd.f32 %v2029_v29, %v585_v31  ;;  %v595_v33 = vadd.f32 %v2029_v29, %v586_v30  ;;  %v797_v30 = vld [vmem:[#allocation8 + $0x10] sm:$0xff] }
 0x130   : > { %v805_v31 = vld [vmem:[#allocation8 + $0x50] sm:$0xff] }
 0x131   : > { %v596_v36 = vmax.f32 %v594_v32, 0.0  ;;  %v597_v37 = vmax.f32 %v595_v33, 0.0  ;;  %v814_v33 = vld [vmem:[#allocation8 + $0x98] sm:$0xff] }
 0x133   : > { %2233 = vmatprep.mubr.msk.f32.mxu1 %vm613_vm0, %v596_v36  ;;  %v2356_v36 = vpack.c.bf16 %v805_v31, %v797_v30  ;;  %v807_v30 = vld [vmem:[#allocation8 + $0x60] sm:$0xff]  ;;  %v801_v31 = vld [vmem:[#allocation8 + $0x30] sm:$0xff] }
 0x134   : > { %2234 = vmatmul.mubr.msk.f32.vlgmr.msra.gmra.mrb[0].mxu1 %vm613_vm0, %v597_v37 }
 0x135   : > { %2309 = vmatpush3.bf16.msra.mxu1 %v2306_v18  ;;  %v883_v18 = vld [vmem:[#allocation8 + $0x2c0] sm:$0xff] }
 0x136   : > { %2311 = vmatprep.subr.bf16.mxu1 %v2310_v38  ;;  %v2344_v19 = vpack.c.bf16 %v883_v18, %v875_v17  ;;  %v909_v17 = vld [vmem:[#allocation8 + $0x390] sm:$0xff] }
 0x137   : > { %v917_v18 = vld [vmem:[#allocation8 + $0x3d0] sm:$0xff] }
 0x138   : > { %2345 = vmatpush1.bf16.msra.mxu0 %v2344_v19  ;;  %v2384_v19 = vpack.c.bf16 %v917_v18, %v909_v17  ;;  %v871_v17 = vld [vmem:[#allocation8 + $0x260] sm:$0xff] }
 0x139   : > { %2313 = vmatpush3.bf16.msra.mxu1 %v2310_v38  ;;  %2347 = vmatprep.subr.bf16.mxu0 %v2346_v22  ;;  %v2358_v38 = vpack.c.bf16 %v822_v34, %v814_v33  ;;  %v802_v22 = vld [vmem:[#allocation8 + $0x38] sm:$0xff]  ;;  %v816_v34 = vld [vmem:[#allocation8 + $0xa8] sm:$0xff] }
 0x13a   : > { %2315 = vmatprep.subr.bf16.mxu1 %v2314_v41 }
 0x13c   : > { %2349 = vmatpush1.bf16.msra.mxu0 %v2348_v25  ;;  %v2418_v25 = vpack.c.bf16 %v810_v24, %v802_v22  ;;  %v880_v22 = vld [vmem:[#allocation8 + $0x2a8] sm:$0xff]  ;;  %v882_v24 = vld [vmem:[#allocation8 + $0x2b8] sm:$0xff] }
 0x13d   : > { %2317 = vmatpush3.bf16.msra.mxu1 %v2314_v41  ;;  %v830_v41 = vld [vmem:[#allocation8 + $0x118] sm:$0xff]  ;;  %2351 = vmatprep.subr.bf16.mxu0 %v2350_v11  ;;  %v872_v11 = vld [vmem:[#allocation8 + $0x268] sm:$0xff] }
 0x13e   : > { %2319 = vmatprep.subr.bf16.mxu1 %v2318_v44  ;;  %v2402_v18 = vpack.c.bf16 %v872_v11, %v864_v10  ;;  %v1399_v10 = vld [vmem:[#allocation9 + $0x98] sm:$0xff]  ;;  %v1430_v11 = vld [vmem:[#allocation9 + $0x190] sm:$0xff] }
 0x140   : > { %2353 = vmatpush1.bf16.msra.mxu0 %v2352_v16  ;;  %v863_v16 = vld [vmem:[#allocation8 + $0x220] sm:$0xff] }
 0x141   : > { %2321 = vmatpush3.bf16.msra.mxu1 %v2318_v44  ;;  %v2362_v44 = vpack.c.bf16 %v838_v42, %v830_v41  ;;  %2387 = vmatprep.subr.bf16.mxu0 %v2386_v23  ;;  %v815_v41 = vld [vmem:[#allocation8 + $0xa0] sm:$0xff]  ;;  %v888_v23 = vld [vmem:[#allocation8 + $0x2e8] sm:$0xff] }
 0x142   : > { %2355 = vmatprep.subr.bf16.mxu1 %v2354_v52  ;;  %v853_v52 = vld [vmem:[#allocation8 + $0x1d0] sm:$0xff]  ;;  %v823_v42 = vld [vmem:[#allocation8 + $0xe0] sm:$0xff] }
 0x143   : > { %v2368_v55 = vpack.c.bf16 %v853_v52, %v845_v51  ;;  %v834_v51 = vld [vmem:[#allocation8 + $0x138] sm:$0xff]  ;;  %v2392_v53 = vpack.c.bf16 %v823_v42, %v815_v41  ;;  %v895_v41 = vld [vmem:[#allocation8 + $0x320] sm:$0xff] }
 0x144   : > { %v842_v52 = vld [vmem:[#allocation8 + $0x178] sm:$0xff]  ;;  %v903_v42 = vld [vmem:[#allocation8 + $0x360] sm:$0xff] }
 0x145   : > { %v2426_v59 = vpack.c.bf16 %v842_v52, %v834_v51  ;;  %v922_v51 = vld [vmem:[#allocation8 + $0x3f8] sm:$0xff]  ;;  %v2412_v52 = vpack.c.bf16 %v903_v42, %v895_v41 }
 0x207   : > { %v2235_v27 = vpop.f32.mrb[0].mxu1 }
 0x208   : > { %v692_v28 = vadd.f32 %v2235_v27, %v2030_v26  ;;  %v686_v29 = vpop.f32.mrb[1].mxu1  ;;  %v2033_v27 = vld [vmem:[%s3370_s6] ss:$0 sm:$0xff] }
 0x209   : > { %v687_v32 = vadd.f32 %v2030_v26, %v686_v29  ;;  %v2964_v26 = vmov 0.0  }
 0x20a   : > { %v696_v37 = vmax.f32 %v692_v28, 0.0  ;;  %987 = vmatprep.mubr.f32.mxu0 %v2964_v26  ;;  %v799_v28 = vld [vmem:[#allocation8 + $0x20] sm:$0xff] }
 0x20b   : > { %v695_v35 = vmax.f32 %v687_v32, 0.0  ;;  %v809_v32 = vld [vmem:[#allocation8 + $0x70] sm:$0xff]  ;;  %v2388_v39 = vpack.c.bf16 %v807_v30, %v799_v28  ;;  %v2436_v28 = vpack.c.bf16 %v873_v21, %v865_v20  ;;  %v887_v30 = vld [vmem:[#allocation8 + $0x2e0] sm:$0xff]  ;;  %v1415_v20 = vld [vmem:[#allocation9 + $0x118] sm:$0xff] }
 0x20c   : > { %v2420_v40 = vpack.c.bf16 %v809_v32, %v801_v31  ;;  %v2406_v31 = vpack.c.bf16 %v888_v23, %v880_v22  ;;  %v1400_v23 = vld [vmem:[#allocation9 + $0xa0] sm:$0xff] }
 0x20d   : > { %2252 = vmatprep.mubr.msk.f32.mxu1 %vm613_vm0, %v695_v35 }
 0x20e   : > { %2253 = vmatmul.mubr.msk.f32.vlgmr.msra.gmra.mrb[2].mxu1 %vm613_vm0, %v696_v37  ;;  %v818_v37 = vld [vmem:[#allocation8 + $0xb8] sm:$0xff] }
 0x20f   : > { %2357 = vmatpush1.bf16.msra.mxu1 %v2356_v36  ;;  %1064 = vmatprep.mubr.f32.mxu1 %v2964_v26  ;;  %v824_v36 = vld [vmem:[#allocation8 + $0xe8] sm:$0xff] }
 0x210   : > { %2359 = vmatprep.subr.bf16.mxu1 %v2358_v38  ;;  %v826_v38 = vld [vmem:[#allocation8 + $0xf8] sm:$0xff]  ;;  %v2390_v48 = vpack.c.bf16 %v824_v36, %v816_v34  ;;  %v889_v34 = vld [vmem:[#allocation8 + $0x2f0] sm:$0xff]  ;;  %v904_v36 = vld [vmem:[#allocation8 + $0x368] sm:$0xff] }
 0x213   : > { %2361 = vmatpush1.bf16.msra.mxu1 %v2360_v43 }
 0x214   : > { %2363 = vmatprep.subr.bf16.mxu1 %v2362_v44 }
 0x217   : > { %2365 = vmatpush1.bf16.msra.mxu1 %v2364_v49  ;;  %v2422_v49 = vpack.c.bf16 %v826_v38, %v818_v37  ;;  %v898_v37 = vld [vmem:[#allocation8 + $0x338] sm:$0xff] }
 0x218   : > { %2367 = vmatprep.subr.bf16.mxu1 %v2366_v50  ;;  %v840_v50 = vld [vmem:[#allocation8 + $0x168] sm:$0xff]  ;;  %v906_v38 = vld [vmem:[#allocation8 + $0x378] sm:$0xff] }
 0x219   : > { %v2394_v58 = vpack.c.bf16 %v840_v50, %v832_v47  ;;  %v2442_v45 = vpack.c.bf16 %v906_v38, %v898_v37  ;;  %v905_v47 = vld [vmem:[#allocation8 + $0x370] sm:$0xff]  ;;  %v914_v50 = vld [vmem:[#allocation8 + $0x3b8] sm:$0xff] }
 0x21a   : > { %v1435_v38 = vld [vmem:[#allocation9 + $0x1b8] sm:$0xff] }
 0x21b   : > { %2369 = vmatpush1.bf16.msra.mxu1 %v2368_v55  ;;  %v831_v55 = vld [vmem:[#allocation8 + $0x120] sm:$0xff] }
 0x21c   : > { %2371 = vmatprep.subr.bf16.mxu1 %v2370_v56  ;;  %v839_v56 = vld [vmem:[#allocation8 + $0x160] sm:$0xff] }
 0x21d   : > { %v2396_v2 = vpack.c.bf16 %v839_v56, %v831_v55  ;;  %v919_v55 = vld [vmem:[#allocation8 + $0x3e0] sm:$0xff] }
 0x21f   : > { %2373 = vmatpush1.bf16.msra.mxu1 %v2372_v61  ;;  %v841_v61 = vld [vmem:[#allocation8 + $0x170] sm:$0xff] }
 0x220   : > { %2375 = vmatprep.subr.bf16.mxu1 %v2374_v62  ;;  %v848_v62 = vld [vmem:[#allocation8 + $0x1a8] sm:$0xff] }
 0x221   : > { %v2398_v6 = vpack.c.bf16 %v856_v63, %v848_v62  ;;  %v1397_v62 = vld [vmem:[#allocation9 + $0x88] sm:$0xff]  ;;  %v1428_v63 = vld [vmem:[#allocation9 + $0x180] sm:$0xff] }
 0x223   : > { %2377 = vmatpush1.bf16.msra.mxu1 %v2376_v3  ;;  %v2428_v3 = vpack.c.bf16 %v841_v61, %v833_v60  ;;  %v921_v60 = vld [vmem:[#allocation8 + $0x3f0] sm:$0xff]  ;;  %v1396_v61 = vld [vmem:[#allocation9 + $0x80] sm:$0xff] }
 0x224   : > { %2379 = vmatprep.subr.bf16.mxu1 %v2378_v4  ;;  %v847_v4 = vld [vmem:[#allocation8 + $0x1a0] sm:$0xff] }
 0x225   : > { %v2400_v14 = vpack.c.bf16 %v855_v5, %v847_v4  ;;  %v1380_v5 = vld [vmem:[#allocation9] sm:$0xff] }
 0x227   : > { %2381 = vmatpush1.bf16.msra.mxu1 %v2380_v7  ;;  %v2430_v7 = vpack.c.bf16 %v858_v1, %v850_v0  ;;  %v1429_v0 = vld [vmem:[#allocation9 + $0x188] sm:$0xff] }
 0x228   : > { %2383 = vmatprep.subr.bf16.mxu1 %v2382_v15  ;;  %v2432_v15 = vpack.c.bf16 %v857_v9, %v849_v8  ;;  %v2482_v4 = vpack.c.bf16 %v1429_v0, %v1428_v63  ;;  %v1413_v8 = vld [vmem:[#allocation9 + $0x108] sm:$0xff]  ;;  %v1398_v9 = vld [vmem:[#allocation9 + $0x90] sm:$0xff]  ;;  %v1439_v0 = vld [vmem:[#allocation9 + $0x1d8] sm:$0xff] }
 0x22b   : > { %2385 = vmatpush1.bf16.msra.mxu1 %v2384_v19  ;;  %v2434_v19 = vpack.c.bf16 %v874_v13, %v866_v12  ;;  %v1431_v12 = vld [vmem:[#allocation9 + $0x198] sm:$0xff] }
 0x22c   : > { %2419 = vmatprep.subr.bf16.mxu1 %v2418_v25  ;;  %v890_v25 = vld [vmem:[#allocation8 + $0x2f8] sm:$0xff] }
 0x22d   : > { %v2438_v32 = vpack.c.bf16 %v890_v25, %v882_v24  ;;  %v1401_v24 = vld [vmem:[#allocation9 + $0xa8] sm:$0xff]  ;;  %v1432_v25 = vld [vmem:[#allocation9 + $0x1a0] sm:$0xff] }
 0x2e1   : > { %v2254_v29 = vpop.f32.mrb[2].mxu1 }
 0x2e2   : > { %v784_v33 = vpop.f32.mrb[3].mxu1  ;;  %v790_v43 = vadd.f32 %v2254_v29, %v2033_v27  ;;  %v879_v29 = vld [vmem:[#allocation8 + $0x2a0] sm:$0xff] }
 0x2e3   : > { %v785_v35 = vadd.f32 %v2033_v27, %v784_v33  ;;  %v2404_v27 = vpack.c.bf16 %v871_v17, %v863_v16  ;;  %v881_v33 = vld [vmem:[#allocation8 + $0x2b0] sm:$0xff]  ;;  %v2454_v16 = vpack.c.bf16 %v1399_v10, %v1398_v9  ;;  %v2486_v17 = vpack.c.bf16 %v1431_v12, %v1430_v11  ;;  %v1409_v9 = vld [vmem:[#allocation9 + $0xe8] sm:$0xff]  ;;  %v1440_v10 = vld [vmem:[#allocation9 + $0x1e0] sm:$0xff] }
 0x2e4   : > { %v3268_v57 = vmax.f32 %v790_v43, 0.0  ;;  %v1441_v12 = vld [vmem:[#allocation9 + $0x1e8] sm:$0xff] }
 0x2e5   : > { %v3264_v44 = vmax.f32 %v785_v35, 0.0  ;;  %v896_v35 = vld [vmem:[#allocation8 + $0x328] sm:$0xff] }
 0x2e6   : > { %v2410_v43 = vpack.c.bf16 %v904_v36, %v896_v35  ;;  %v1402_v35 = vld [vmem:[#allocation9 + $0xb0] sm:$0xff]  ;;  %v1403_v36 = vld [vmem:[#allocation9 + $0xb8] sm:$0xff] }
 0x2e7   : > { %988 = vmatmul.mubr.f32.vlgmr.msra.gmra.mrb[0].mxu0 %v3264_v44  ;;  %1065 = vmatmul.mubr.f32.vlgmr.msra.gmra.mrb[4].mxu1 %v3264_v44  ;;  %v2462_v37 = vpack.c.bf16 %v1403_v36, %v1402_v35  ;;  %v1493_v36 = vld [vmem:[#allocation9 + $0x388] sm:$0xff] }
 0x2e8   : > { %2389 = vmatpush1.bf16.msra.mxu0 %v2388_v39  ;;  %2421 = vmatpush1.bf16.msra.mxu1 %v2420_v40  ;;  %v2408_v39 = vpack.c.bf16 %v887_v30, %v879_v29  ;;  %v2440_v40 = vpack.c.bf16 %v889_v34, %v881_v33  ;;  %v1385_v29 = vld [vmem:[#allocation9 + $0x28] sm:$0xff] }
 0x2e9   : > { %993 = vmatprep.mubr.f32.mxu0 %v2964_v26  ;;  %1070 = vmatprep.mubr.f32.mxu1 %v2964_v26  ;;  %v1417_v33 = vld [vmem:[#allocation9 + $0x128] sm:$0xff] }
 0x2ea   : > { %2391 = vmatprep.subr.bf16.mxu0 %v2390_v48  ;;  %2423 = vmatprep.subr.bf16.mxu1 %v2422_v49  ;;  %v912_v48 = vld [vmem:[#allocation8 + $0x3a8] sm:$0xff] }
 0x2eb   : > { %994 = vmatmul.mubr.f32.gmra.mrb[2].mxu0 %v3268_v57  ;;  %1071 = vmatmul.mubr.f32.gmra.mrb[6].mxu1 %v3268_v57  ;;  %v920_v49 = vld [vmem:[#allocation8 + $0x3e8] sm:$0xff] }
 0x2ec   : > { %2393 = vmatpush1.bf16.msra.mxu0 %v2392_v53  ;;  %2425 = vmatpush1.bf16.msra.mxu1 %v2424_v54  ;;  %v2444_v53 = vpack.c.bf16 %v905_v47, %v897_v46  ;;  %v911_v54 = vld [vmem:[#allocation8 + $0x3a0] sm:$0xff]  ;;  %v2414_v56 = vpack.c.bf16 %v920_v49, %v912_v48  ;;  %v1405_v48 = vld [vmem:[#allocation9 + $0xc8] sm:$0xff] }
 0x2ed   : > { %2395 = vmatprep.subr.bf16.mxu0 %v2394_v58  ;;  %2427 = vmatprep.subr.bf16.mxu1 %v2426_v59  ;;  %v2446_v58 = vpack.c.bf16 %v922_v51, %v914_v50  ;;  %v913_v59 = vld [vmem:[#allocation8 + $0x3b0] sm:$0xff]  ;;  %v2416_v1 = vpack.c.bf16 %v919_v55, %v911_v54  ;;  %v1404_v47 = vld [vmem:[#allocation9 + $0xc0] sm:$0xff]  ;;  %v1437_v51 = vld [vmem:[#allocation9 + $0x1c8] sm:$0xff] }
 0x2ee   : > { %1141 = vmatprep.mubr.f32.mxu0 %v2964_v26  ;;  %1218 = vmatprep.mubr.f32.mxu1 %v2964_v26  ;;  %v1436_v49 = vld [vmem:[#allocation9 + $0x1c0] sm:$0xff]  ;;  %v2466_v50 = vpack.c.bf16 %v1405_v48, %v1404_v47 }
 0x2ef   : > { %v2498_v54 = vpack.c.bf16 %v1437_v51, %v1436_v49 }
 0x2f0   : > { %2397 = vmatpush1.bf16.msra.mxu0 %v2396_v2  ;;  %2429 = vmatpush1.bf16.msra.mxu1 %v2428_v3  ;;  %v2448_v2 = vpack.c.bf16 %v921_v60, %v913_v59  ;;  %v2450_v3 = vpack.c.bf16 %v1397_v62, %v1396_v61  ;;  %v1406_v60 = vld [vmem:[#allocation9 + $0xd0] sm:$0xff]  ;;  %v1407_v61 = vld [vmem:[#allocation9 + $0xd8] sm:$0xff] }
 0x2f1   : > { %2399 = vmatprep.subr.bf16.mxu0 %v2398_v6  ;;  %2431 = vmatprep.subr.bf16.mxu1 %v2430_v7  ;;  %v1381_v6 = vld [vmem:[#allocation9 + $0x8] sm:$0xff]  ;;  %v1412_v7 = vld [vmem:[#allocation9 + $0x100] sm:$0xff]  ;;  %v1438_v62 = vld [vmem:[#allocation9 + $0x1d0] sm:$0xff]  ;;  %v2470_v63 = vpack.c.bf16 %v1407_v61, %v1406_v60 }
 0x2f2   : > { %v2452_v13 = vpack.c.bf16 %v1381_v6, %v1380_v5  ;;  %v1422_v5 = vld [vmem:[#allocation9 + $0x150] sm:$0xff]  ;;  %v1423_v6 = vld [vmem:[#allocation9 + $0x158] sm:$0xff] }
 0x2f4   : > { %2401 = vmatpush1.bf16.msra.mxu0 %v2400_v14  ;;  %2433 = vmatpush1.bf16.msra.mxu1 %v2432_v15  ;;  %v2484_v14 = vpack.c.bf16 %v1413_v8, %v1412_v7  ;;  %v1382_v15 = vld [vmem:[#allocation9 + $0x10] sm:$0xff]  ;;  %v2504_v7 = vpack.c.bf16 %v1423_v6, %v1422_v5  ;;  %v1408_v8 = vld [vmem:[#allocation9 + $0xe0] sm:$0xff] }
 0x2f5   : > { %2403 = vmatprep.subr.bf16.mxu0 %v2402_v18  ;;  %2435 = vmatprep.subr.bf16.mxu1 %v2434_v19  ;;  %v1383_v18 = vld [vmem:[#allocation9 + $0x18] sm:$0xff]  ;;  %v1414_v19 = vld [vmem:[#allocation9 + $0x110] sm:$0xff]  ;;  %v2474_v11 = vpack.c.bf16 %v1409_v9, %v1408_v8 }
 0x2f6   : > { %v2456_v21 = vpack.c.bf16 %v1383_v18, %v1382_v15  ;;  %v2488_v22 = vpack.c.bf16 %v1415_v20, %v1414_v19  ;;  %v2506_v15 = vpack.c.bf16 %v1441_v12, %v1440_v10  ;;  %v1425_v18 = vld [vmem:[#allocation9 + $0x168] sm:$0xff]  ;;  %v1410_v20 = vld [vmem:[#allocation9 + $0xf0] sm:$0xff] }
 0x2f8   : > { %2405 = vmatpush1.bf16.msra.mxu0 %v2404_v27  ;;  %2437 = vmatpush1.bf16.msra.mxu1 %v2436_v28  ;;  %v1433_v27 = vld [vmem:[#allocation9 + $0x1a8] sm:$0xff]  ;;  %v1384_v28 = vld [vmem:[#allocation9 + $0x20] sm:$0xff] }
 0x2f9   : > { %2407 = vmatprep.subr.bf16.mxu0 %v2406_v31  ;;  %2439 = vmatprep.subr.bf16.mxu1 %v2438_v32  ;;  %v2490_v30 = vpack.c.bf16 %v1433_v27, %v1432_v25  ;;  %v2460_v31 = vpack.c.bf16 %v1385_v29, %v1384_v28  ;;  %v1416_v32 = vld [vmem:[#allocation9 + $0x120] sm:$0xff]  ;;  %v1394_v25 = vld [vmem:[#allocation9 + $0x70] sm:$0xff] }
 0x2fa   : > { %v2492_v34 = vpack.c.bf16 %v1417_v33, %v1416_v32  ;;  %v1426_v29 = vld [vmem:[#allocation9 + $0x170] sm:$0xff]  ;;  %v1460_v32 = vld [vmem:[#allocation9 + $0x280] sm:$0xff]  ;;  %v1461_v33 = vld [vmem:[#allocation9 + $0x288] sm:$0xff] }
 0x2fb   : > { %v2514_v35 = vpack.c.bf16 %v1461_v33, %v1460_v32  ;;  %v1494_v32 = vld [vmem:[#allocation9 + $0x390] sm:$0xff]  ;;  %v1495_v33 = vld [vmem:[#allocation9 + $0x398] sm:$0xff] }
 0x2fc   : > { %2409 = vmatpush1.bf16.msra.mxu0 %v2408_v39  ;;  %2441 = vmatpush1.bf16.msra.mxu1 %v2440_v40  ;;  %v1386_v39 = vld [vmem:[#allocation9 + $0x30] sm:$0xff]  ;;  %v1387_v40 = vld [vmem:[#allocation9 + $0x38] sm:$0xff] }
 0x2fd   : > { %2411 = vmatprep.subr.bf16.mxu0 %v2410_v43  ;;  %2443 = vmatprep.subr.bf16.mxu1 %v2442_v45  ;;  %v2464_v42 = vpack.c.bf16 %v1387_v40, %v1386_v39  ;;  %v1418_v43 = vld [vmem:[#allocation9 + $0x130] sm:$0xff]  ;;  %v1419_v45 = vld [vmem:[#allocation9 + $0x138] sm:$0xff] }
 0x2fe   : > { %v2496_v46 = vpack.c.bf16 %v1419_v45, %v1418_v43 }
 0x300   : > { %2413 = vmatpush1.bf16.msra.mxu0 %v2412_v52  ;;  %2445 = vmatpush1.bf16.msra.mxu1 %v2444_v53  ;;  %v1388_v52 = vld [vmem:[#allocation9 + $0x40] sm:$0xff]  ;;  %v1389_v53 = vld [vmem:[#allocation9 + $0x48] sm:$0xff] }
 0x301   : > { %2415 = vmatprep.subr.bf16.mxu0 %v2414_v56  ;;  %2447 = vmatprep.subr.bf16.mxu1 %v2446_v58  ;;  %v2468_v55 = vpack.c.bf16 %v1389_v53, %v1388_v52  ;;  %v1420_v56 = vld [vmem:[#allocation9 + $0x140] sm:$0xff]  ;;  %v1421_v58 = vld [vmem:[#allocation9 + $0x148] sm:$0xff] }
 0x302   : > { %v2500_v59 = vpack.c.bf16 %v1421_v58, %v1420_v56 }
 0x304   : > { %2417 = vmatpush1.bf16.msra.mxu0 %v2416_v1  ;;  %2449 = vmatpush1.bf16.msra.mxu1 %v2448_v2  ;;  %v1390_v1 = vld [vmem:[#allocation9 + $0x50] sm:$0xff]  ;;  %v1391_v2 = vld [vmem:[#allocation9 + $0x58] sm:$0xff] }
 0x305   : > { %2451 = vmatprep.subr.bf16.mxu0 %v2450_v3  ;;  %2483 = vmatprep.subr.bf16.mxu1 %v2482_v4  ;;  %v2502_v3 = vpack.c.bf16 %v1439_v0, %v1438_v62  ;;  %v2472_v4 = vpack.c.bf16 %v1391_v2, %v1390_v1  ;;  %v3289_v1 = vld [vmem:[%s3372_s8] sm:$0xff] }
 0x307   : > { %1142 = vmatmul.mubr.f32.vlgmr.msra.gmra.mrb[4].mxu0 %v3264_v44  ;;  %1219 = vmatmul.mubr.f32.vlgmr.msra.gmra.mrb[8].mxu1 %v3264_v44  ;;  %v2458_v44 = vpack.c.bf16 %v1401_v24, %v1400_v23  ;;  %v1443_v24 = vld [vmem:[#allocation9 + $0x1f8] sm:$0xff] }
 0x308   : > { %1147 = vmatprep.mubr.f32.mxu0 %v2964_v26  ;;  %1224 = vmatprep.mubr.f32.mxu1 %v2964_v26 }
 0x309   : > { %2453 = vmatpush3.bf16.msra.mxu0 %v2452_v13  ;;  %2485 = vmatpush3.bf16.msra.mxu1 %v2484_v14  ;;  %v1392_v13 = vld [vmem:[#allocation9 + $0x60] sm:$0xff]  ;;  %v1393_v14 = vld [vmem:[#allocation9 + $0x68] sm:$0xff] }
 0x30a   : > { %2455 = vmatprep.subr.bf16.mxu0 %v2454_v16  ;;  %2487 = vmatprep.subr.bf16.mxu1 %v2486_v17  ;;  %v2476_v16 = vpack.c.bf16 %v1393_v14, %v1392_v13  ;;  %v1424_v17 = vld [vmem:[#allocation9 + $0x160] sm:$0xff] }
 0x30b   : > { %1148 = vmatmul.mubr.f32.gmra.mrb[6].mxu0 %v3268_v57  ;;  %1225 = vmatmul.mubr.f32.gmra.mrb[10].mxu1 %v3268_v57  ;;  %v1434_v57 = vld [vmem:[#allocation9 + $0x1b0] sm:$0xff]  ;;  %v2508_v19 = vpack.c.bf16 %v1425_v18, %v1424_v17 }
 0x30c   : > { %v2494_v41 = vpack.c.bf16 %v1435_v38, %v1434_v57 }
 0x30d   : > { %2457 = vmatpush3.bf16.msra.mxu0 %v2456_v21  ;;  %2489 = vmatpush3.bf16.msra.mxu1 %v2488_v22  ;;  %v1411_v21 = vld [vmem:[#allocation9 + $0xf8] sm:$0xff]  ;;  %v1442_v22 = vld [vmem:[#allocation9 + $0x1f0] sm:$0xff] }
 0x30e   : > { %2459 = vmatprep.subr.bf16.mxu0 %v2458_v44  ;;  %2491 = vmatprep.subr.bf16.mxu1 %v2490_v30  ;;  %v2478_v23 = vpack.c.bf16 %v1411_v21, %v1410_v20  ;;  %v1395_v44 = vld [vmem:[#allocation9 + $0x78] sm:$0xff]  ;;  %v2510_v27 = vpack.c.bf16 %v1443_v24, %v1442_v22  ;;  %v1444_v22 = vld [vmem:[#allocation9 + $0x200] sm:$0xff] }
 0x30f   : > { %v2480_v28 = vpack.c.bf16 %v1395_v44, %v1394_v25  ;;  %v1427_v30 = vld [vmem:[#allocation9 + $0x178] sm:$0xff]  ;;  %v1476_v44 = vld [vmem:[#allocation9 + $0x300] sm:$0xff] }
 0x311   : > { %2461 = vmatpush3.bf16.msra.mxu0 %v2460_v31  ;;  %2493 = vmatpush3.bf16.msra.mxu1 %v2492_v34  ;;  %v2512_v31 = vpack.c.bf16 %v1427_v30, %v1426_v29  ;;  %v1492_v34 = vld [vmem:[#allocation9 + $0x380] sm:$0xff] }
 0x312   : > { %2463 = vmatprep.subr.bf16.mxu0 %v2462_v37  ;;  %2495 = vmatprep.subr.bf16.mxu1 %v2494_v41  ;;  %v2546_v57 = vpack.c.bf16 %v1493_v36, %v1492_v34  ;;  %v1324_v41 = vlaneseq }
 0x314   : > { %v3282_v52 = vshrl.u32 %v1324_v41, 7 }
 0x315   : > { %2465 = vmatpush3.bf16.msra.mxu0 %v2464_v42  ;;  %2497 = vmatpush3.bf16.msra.mxu1 %v2496_v46 }
 0x316   : > { %2467 = vmatprep.subr.bf16.mxu0 %v2466_v50  ;;  %2499 = vmatprep.subr.bf16.mxu1 %v2498_v54  ;;  %v1326_v62 = vsub.s32 0, %v3282_v52  ;;  %v1334_v0 = vsub.s32 2, %v3282_v52  ;;  %v1338_v5 = vsub.s32 3, %v3282_v52 }
 0x318   : > { %v1335_v13 = vrot.slane %v3289_v1, %v1334_v0  ;;  %v1339_v17 = vrot.slane %v3289_v1, %v1338_v5 }
 0x319   : > { %2469 = vmatpush3.bf16.msra.mxu0 %v2468_v55  ;;  %2501 = vmatpush3.bf16.msra.mxu1 %v2500_v59 }
 0x31a   : > { %2471 = vmatprep.subr.bf16.mxu0 %v2470_v63  ;;  %2503 = vmatprep.subr.bf16.mxu1 %v2502_v3 }
 0x31d   : > { %2473 = vmatpush3.bf16.msra.mxu0 %v2472_v4  ;;  %2505 = vmatpush3.bf16.msra.mxu1 %v2504_v7  ;;  %v1330_v4 = vsub.s32 1, %v3282_v52 }
 0x31e   : > { %2475 = vmatprep.subr.bf16.mxu0 %v2474_v11  ;;  %2507 = vmatprep.subr.bf16.mxu1 %v2506_v15  ;;  %v1327_v11 = vrot.slane %v3289_v1, %v1326_v62  ;;  %v1498_v62 = vld [vmem:[#allocation9 + $0x3b0] sm:$0xff] }
 0x321   : > { %2477 = vmatpush3.bf16.msra.mxu0 %v2476_v16  ;;  %2509 = vmatpush3.bf16.msra.mxu1 %v2508_v19  ;;  %v1331_v16 = vrot.slane %v3289_v1, %v1330_v4  ;;  %v1451_v4 = vld [vmem:[#allocation9 + $0x238] sm:$0xff] }
 0x322   : > { %2479 = vmatprep.subr.bf16.mxu0 %v2478_v23  ;;  %2511 = vmatprep.subr.bf16.mxu1 %v2510_v27  ;;  %v1445_v23 = vld [vmem:[#allocation9 + $0x208] sm:$0xff] }
 0x323   : > { %v1477_v27 = vld [vmem:[#allocation9 + $0x308] sm:$0xff]  ;;  %v2516_v36 = vpack.c.bf16 %v1445_v23, %v1444_v22  ;;  %v1484_v23 = vld [vmem:[#allocation9 + $0x340] sm:$0xff] }
 0x325   : > { %2481 = vmatpush3.bf16.msra.mxu0 %v2480_v28  ;;  %2513 = vmatpush3.bf16.msra.mxu1 %v2512_v31  ;;  %v1462_v28 = vld [vmem:[#allocation9 + $0x290] sm:$0xff]  ;;  %v1463_v31 = vld [vmem:[#allocation9 + $0x298] sm:$0xff] }
 0x326   : > { %2515 = vmatprep.subr.bf16.mxu0 %v2514_v35  ;;  %2547 = vmatprep.subr.bf16.mxu1 %v2546_v57  ;;  %v2548_v57 = vpack.c.bf16 %v1477_v27, %v1476_v44  ;;  %v2518_v41 = vpack.c.bf16 %v1463_v31, %v1462_v28  ;;  %v1471_v28 = vld [vmem:[#allocation9 + $0x2d8] sm:$0xff] }
 0x3ba   : > { %v989_v37 = vpop.f32.mrb[0].mxu0  ;;  %v1066_v38 = vpop.f32.mrb[4].mxu1 }
 0x3bb   : > { %v991_v39 = vpop.f32.mrb[1].mxu0  ;;  %v1068_v40 = vpop.f32.mrb[5].mxu1 }
 0x3be   : > { %v995_v42 = vpop.f32.mrb[2].mxu0  ;;  %v1072_v43 = vpop.f32.mrb[6].mxu1 }
 0x3bf   : > { %v1231_v45 = vmax.f32 %v989_v37, %v995_v42  ;;  %v1233_v46 = vmax.f32 %v1066_v38, %v1072_v43  ;;  %v997_v47 = vpop.f32.mrb[3].mxu0  ;;  %v1074_v48 = vpop.f32.mrb[7].mxu1  ;;  %v1446_v37 = vld [vmem:[#allocation9 + $0x210] sm:$0xff]  ;;  %v1447_v38 = vld [vmem:[#allocation9 + $0x218] sm:$0xff]  ;;  %v2550_v42 = vpack.c.bf16 %v1495_v33, %v1494_v32 }
 0x3c0   : > { %v1232_v49 = vmax.f32 %v991_v39, %v997_v47  ;;  %v1234_v50 = vmax.f32 %v1068_v40, %v1074_v48  ;;  %v1478_v43 = vld [vmem:[#allocation9 + $0x310] sm:$0xff]  ;;  %v1465_v47 = vld [vmem:[#allocation9 + $0x2a8] sm:$0xff]  ;;  %v1496_v48 = vld [vmem:[#allocation9 + $0x3a0] sm:$0xff] }
 0x3c1   : > { %v1274_v51 = vrot.slane %v1231_v45, 4  ;;  %v1286_v53 = vrot.slane %v1233_v46, 4 }
 0x3c2   : > { %v1280_v54 = vrot.slane %v1232_v49, 4  ;;  %v1292_v55 = vrot.slane %v1234_v50, 4 }
 0x3c3   : > { %v1275_v56 = vmax.f32 %v1231_v45, %v1274_v51  ;;  %v1287_v58 = vmax.f32 %v1233_v46, %v1286_v53  ;;  %v1479_v45 = vld [vmem:[#allocation9 + $0x318] sm:$0xff]  ;;  %v1464_v46 = vld [vmem:[#allocation9 + $0x2a0] sm:$0xff] }
 0x3c4   : > { %v1281_v59 = vmax.f32 %v1232_v49, %v1280_v54  ;;  %v1293_v60 = vmax.f32 %v1234_v50, %v1292_v55  ;;  %v1497_v49 = vld [vmem:[#allocation9 + $0x3a8] sm:$0xff]  ;;  %v2520_v50 = vpack.c.bf16 %v1447_v38, %v1446_v37  ;;  %v2552_v51 = vpack.c.bf16 %v1479_v45, %v1478_v43  ;;  %v1448_v53 = vld [vmem:[#allocation9 + $0x220] sm:$0xff] }
 0x3c5   : > { %v1276_v61 = vrot.slane %v1275_v56, 2  ;;  %v1288_v63 = vrot.slane %v1287_v58, 2  ;;  %v1449_v54 = vld [vmem:[#allocation9 + $0x228] sm:$0xff]  ;;  %v2522_v55 = vpack.c.bf16 %v1465_v47, %v1464_v46  ;;  %v1472_v47 = vld [vmem:[#allocation9 + $0x2e0] sm:$0xff] }
 0x3c6   : > { %v1282_v2 = vrot.slane %v1281_v59, 2  ;;  %v1294_v3 = vrot.slane %v1293_v60, 2  ;;  %v2524_v0 = vpack.c.bf16 %v1449_v54, %v1448_v53  ;;  %v1504_v53 = vld [vmem:[#allocation9 + $0x3e0] sm:$0xff]  ;;  %v1505_v54 = vld [vmem:[#allocation9 + $0x3e8] sm:$0xff] }
 0x3c7   : > { %v1277_v6 = vmax.f32 %v1275_v56, %v1276_v61  ;;  %v1289_v7 = vmax.f32 %v1287_v58, %v1288_v63  ;;  %v2554_v56 = vpack.c.bf16 %v1497_v49, %v1496_v48  ;;  %v1480_v58 = vld [vmem:[#allocation9 + $0x320] sm:$0xff]  ;;  %v1467_v61 = vld [vmem:[#allocation9 + $0x2b8] sm:$0xff]  ;;  %v1473_v48 = vld [vmem:[#allocation9 + $0x2e8] sm:$0xff] }
 0x3c8   : > { %v1283_v8 = vmax.f32 %v1281_v59, %v1282_v2  ;;  %v1295_v9 = vmax.f32 %v1293_v60, %v1294_v3  ;;  %v1481_v59 = vld [vmem:[#allocation9 + $0x328] sm:$0xff]  ;;  %v1466_v60 = vld [vmem:[#allocation9 + $0x2b0] sm:$0xff]  ;;  %v1499_v63 = vld [vmem:[#allocation9 + $0x3b8] sm:$0xff] }
 0x3c9   : > { %v1278_v10 = vrot.slane %v1277_v6, 1  ;;  %v1290_v12 = vrot.slane %v1289_v7, 1  ;;  %v2556_v2 = vpack.c.bf16 %v1481_v59, %v1480_v58  ;;  %v1450_v3 = vld [vmem:[#allocation9 + $0x230] sm:$0xff]  ;;  %v2526_v5 = vpack.c.bf16 %v1467_v61, %v1466_v60  ;;  %v1456_v59 = vld [vmem:[#allocation9 + $0x260] sm:$0xff]  ;;  %v1457_v60 = vld [vmem:[#allocation9 + $0x268] sm:$0xff] }
 0x3ca   : > { %v1284_v14 = vrot.slane %v1283_v8, 1  ;;  %v1296_v15 = vrot.slane %v1295_v9, 1  ;;  %v1342_v61 = vsub.s32 4, %v3282_v52 }
 0x3cb   : > { %v1279_v18 = vmax.f32 %v1277_v6, %v1278_v10  ;;  %v1291_v19 = vmax.f32 %v1289_v7, %v1290_v12  ;;  %v2558_v6 = vpack.c.bf16 %v1499_v63, %v1498_v62  ;;  %v1482_v7 = vld [vmem:[#allocation9 + $0x330] sm:$0xff]  ;;  %v1469_v12 = vld [vmem:[#allocation9 + $0x2c8] sm:$0xff] }
 0x3cc   : > { %v1285_v20 = vmax.f32 %v1283_v8, %v1284_v14  ;;  %v1297_v21 = vmax.f32 %v1295_v9, %v1296_v15  ;;  %v1483_v8 = vld [vmem:[#allocation9 + $0x338] sm:$0xff]  ;;  %v1468_v9 = vld [vmem:[#allocation9 + $0x2c0] sm:$0xff]  ;;  %v1501_v14 = vld [vmem:[#allocation9 + $0x3c8] sm:$0xff] }
 0x3cd   : > { %v1364_v24 = vadd.f32 %v1327_v11, %v1279_v18  ;;  %v1366_v25 = vadd.f32 %v1335_v13, %v1291_v19  ;;  %v1500_v13 = vld [vmem:[#allocation9 + $0x3c0] sm:$0xff]  ;;  %v2560_v18 = vpack.c.bf16 %v1483_v8, %v1482_v7  ;;  %v2570_v7 = vpack.c.bf16 %v1505_v54, %v1504_v53  ;;  %v1474_v8 = vld [vmem:[#allocation9 + $0x2f0] sm:$0xff]  ;;  %v1793_v54 = vld [vmem:[#allocation11 + $0x18] sm:$0xff] }
 0x3ce   : > { %v1365_v29 = vadd.f32 %v1331_v16, %v1285_v20  ;;  %v1367_v30 = vadd.f32 %v1339_v17, %v1297_v21  ;;  %v2528_v17 = vpack.c.bf16 %v1451_v4, %v1450_v3  ;;  %v1452_v19 = vld [vmem:[#allocation9 + $0x240] sm:$0xff]  ;;  %v1453_v20 = vld [vmem:[#allocation9 + $0x248] sm:$0xff]  ;;  %v2530_v21 = vpack.c.bf16 %v1469_v12, %v1468_v9 }
 0x3cf   : > { %v1372_v39 = vmax.f32 %v1364_v24, 0.0  ;;  %v1374_v40 = vmax.f32 %v1366_v25, 0.0  ;;  %v2562_v22 = vpack.c.bf16 %v1501_v14, %v1500_v13  ;;  %v1485_v24 = vld [vmem:[#allocation9 + $0x348] sm:$0xff]  ;;  %v1470_v25 = vld [vmem:[#allocation9 + $0x2d0] sm:$0xff]  ;;  %v1350_v4 = vsub.s32 6, %v3282_v52  ;;  %v1475_v13 = vld [vmem:[#allocation9 + $0x2f8] sm:$0xff] }
 0x3d0   : > { %v1373_v34 = vmax.f32 %v1365_v29, 0.0  ;;  %v1375_v35 = vmax.f32 %v1367_v30, 0.0  ;;  %v1502_v29 = vld [vmem:[#allocation9 + $0x3d0] sm:$0xff]  ;;  %v1503_v30 = vld [vmem:[#allocation9 + $0x3d8] sm:$0xff]  ;;  %v2534_v45 = vpack.c.bf16 %v1471_v28, %v1470_v25  ;;  %v1489_v3 = vld [vmem:[#allocation9 + $0x368] sm:$0xff]  ;;  %v1346_v9 = vsub.s32 5, %v3282_v52 }
 0x3d1   : > { %v2566_v46 = vpack.c.bf16 %v1503_v30, %v1502_v29  ;;  %v2540_v12 = vpack.c.bf16 %v1457_v60, %v1456_v59  ;;  %v1506_v14 = vld [vmem:[#allocation9 + $0x3f0] sm:$0xff]  ;;  %v1351_v25 = vrot.slane %v3289_v1, %v1350_v4  ;;  %v2542_v28 = vpack.c.bf16 %v1475_v13, %v1474_v8  ;;  %v1491_v30 = vld [vmem:[#allocation9 + $0x378] sm:$0xff] }
 0x3d2   : > { %1573 = vmatprep.mubr.f32.mxu0 %v1373_v34  ;;  %1643 = vmatprep.mubr.f32.mxu1 %v1375_v35  ;;  %v2532_v35 = vpack.c.bf16 %v1453_v20, %v1452_v19  ;;  %v1343_v20 = vrot.slane %v3289_v1, %v1342_v61  ;;  %v1796_v60 = vld [vmem:[#allocation11 + $0x30] sm:$0xff]  ;;  %v1797_v61 = vld [vmem:[#allocation11 + $0x38] sm:$0xff] }
 0x3d3   : > { %1574 = vmatmul.mubr.f32.vlgmr.msra.gmra.mrb[8].mxu0 %v1372_v39  ;;  %1644 = vmatmul.mubr.f32.vlgmr.msra.gmra.mrb[12].mxu1 %v1374_v40  ;;  %v2564_v39 = vpack.c.bf16 %v1485_v24, %v1484_v23  ;;  %v1486_v40 = vld [vmem:[#allocation9 + $0x350] sm:$0xff]  ;;  %v1459_v24 = vld [vmem:[#allocation9 + $0x278] sm:$0xff] }
 0x3d4   : > { %2517 = vmatpush3.bf16.msra.mxu0 %v2516_v36  ;;  %2549 = vmatpush3.bf16.msra.mxu1 %v2548_v57  ;;  %v1454_v36 = vld [vmem:[#allocation9 + $0x250] sm:$0xff]  ;;  %v1455_v57 = vld [vmem:[#allocation9 + $0x258] sm:$0xff] }
 0x3d5   : > { %2519 = vmatprep.subr.bf16.mxu0 %v2518_v41  ;;  %2551 = vmatprep.subr.bf16.mxu1 %v2550_v42  ;;  %v1487_v41 = vld [vmem:[#allocation9 + $0x358] sm:$0xff]  ;;  %v1458_v23 = vld [vmem:[#allocation9 + $0x270] sm:$0xff] }
 0x3d6   : > { %v2568_v58 = vpack.c.bf16 %v1487_v41, %v1486_v40  ;;  %v1801_v4 = vld [vmem:[#allocation11 + $0x58] sm:$0xff] }
 0x3d8   : > { %2521 = vmatpush3.bf16.msra.mxu0 %v2520_v50  ;;  %2553 = vmatpush3.bf16.msra.mxu1 %v2552_v51  ;;  %v2536_v51 = vpack.c.bf16 %v1455_v57, %v1454_v36  ;;  %v2544_v57 = vpack.c.bf16 %v1459_v24, %v1458_v23 }
 0x3d9   : > { %2523 = vmatprep.subr.bf16.mxu0 %v2522_v55  ;;  %2555 = vmatprep.subr.bf16.mxu1 %v2554_v56 }
 0x3da   : > { %v1143_v10 = vpop.f32.mrb[4].mxu0  ;;  %v1220_v11 = vpop.f32.mrb[8].mxu1 }
 0x3db   : > { %v1145_v15 = vpop.f32.mrb[5].mxu0  ;;  %v1222_v16 = vpop.f32.mrb[9].mxu1 }
 0x3dc   : > { %2525 = vmatpush3.bf16.msra.mxu0 %v2524_v0  ;;  %2557 = vmatpush3.bf16.msra.mxu1 %v2556_v2  ;;  %v2538_v0 = vpack.c.bf16 %v1473_v48, %v1472_v47  ;;  %v1488_v2 = vld [vmem:[#allocation9 + $0x360] sm:$0xff] }
 0x3dd   : > { %2527 = vmatprep.subr.bf16.mxu0 %v2526_v5  ;;  %2559 = vmatprep.subr.bf16.mxu1 %v2558_v6  ;;  %v2572_v19 = vpack.c.bf16 %v1489_v3, %v1488_v2  ;;  %v1790_v48 = vld [vmem:[#allocation11] sm:$0xff]  ;;  %v1800_v3 = vld [vmem:[#allocation11 + $0x50] sm:$0xff] }
 0x3de   : > { %v1149_v44 = vpop.f32.mrb[6].mxu0  ;;  %v1226_v27 = vpop.f32.mrb[10].mxu1 }
 0x3df   : > { %v1235_v31 = vmax.f32 %v1143_v10, %v1149_v44  ;;  %v1237_v32 = vmax.f32 %v1220_v11, %v1226_v27  ;;  %v1151_v33 = vpop.f32.mrb[7].mxu0  ;;  %v1228_v34 = vpop.f32.mrb[11].mxu1 }
 0x3e0   : > { %v1236_v37 = vmax.f32 %v1145_v15, %v1151_v33  ;;  %v1238_v38 = vmax.f32 %v1222_v16, %v1228_v34  ;;  %2529 = vmatpush3.bf16.msra.mxu0 %v2528_v17  ;;  %2561 = vmatpush3.bf16.msra.mxu1 %v2560_v18  ;;  %v1507_v15 = vld [vmem:[#allocation9 + $0x3f8] sm:$0xff]  ;;  %v1354_v16 = vsub.s32 7, %v3282_v52  ;;  %v1490_v52 = vld [vmem:[#allocation9 + $0x370] sm:$0xff]  ;;  %v1347_v33 = vrot.slane %v3289_v1, %v1346_v9 }
 0x3e1   : > { %v1298_v42 = vrot.slane %v1235_v31, 4  ;;  %v1310_v43 = vrot.slane %v1237_v32, 4  ;;  %2531 = vmatprep.subr.bf16.mxu0 %v2530_v21  ;;  %2563 = vmatprep.subr.bf16.mxu1 %v2562_v22  ;;  %v2574_v29 = vpack.c.bf16 %v1507_v15, %v1506_v14  ;;  %v1804_v9 = vld [vmem:[#allocation11 + $0x70] sm:$0xff]  ;;  %v1508_v14 = vld [vmem:[%s3374_s10] sm:$0x1] }
 0x3e2   : > { %v1304_v49 = vrot.slane %v1236_v37, 4  ;;  %v1316_v50 = vrot.slane %v1238_v38, 4  ;;  %v1355_v34 = vrot.slane %v3289_v1, %v1354_v16 }
 0x3e3   : > { %v1299_v55 = vmax.f32 %v1235_v31, %v1298_v42  ;;  %v1311_v56 = vmax.f32 %v1237_v32, %v1310_v43 }
 0x3e4   : > { %v1305_v62 = vmax.f32 %v1236_v37, %v1304_v49  ;;  %v1317_v63 = vmax.f32 %v1238_v38, %v1316_v50  ;;  %2533 = vmatpush3.bf16.msra.mxu0 %v2532_v35  ;;  %2565 = vmatpush3.bf16.msra.mxu1 %v2564_v39  ;;  %v2576_v37 = vpack.c.bf16 %v1491_v30, %v1490_v52  ;;  %v1791_v49 = vld [vmem:[#allocation11 + $0x8] sm:$0xff]  ;;  %v1792_v50 = vld [vmem:[#allocation11 + $0x10] sm:$0xff] }
 0x3e5   : > { %v1300_v5 = vrot.slane %v1299_v55, 2  ;;  %v1312_v6 = vrot.slane %v1311_v56, 2  ;;  %2535 = vmatprep.subr.bf16.mxu0 %v2534_v45  ;;  %2567 = vmatprep.subr.bf16.mxu1 %v2566_v46  ;;  %v2579_v53 = vpack.c.bf16 %v1791_v49, %v1790_v48 }
 0x3e6   : > { %v1306_v10 = vrot.slane %v1305_v62, 2  ;;  %v1318_v11 = vrot.slane %v1317_v63, 2 }
 0x3e7   : > { %v1301_v17 = vmax.f32 %v1299_v55, %v1300_v5  ;;  %v1313_v18 = vmax.f32 %v1311_v56, %v1312_v6  ;;  %v2582_v55 = vpack.c.bf16 %v1793_v54, %v1792_v50  ;;  %v1794_v56 = vld [vmem:[#allocation11 + $0x20] sm:$0xff]  ;;  %v2594_v5 = vpack.c.bf16 %v1801_v4, %v1800_v3 }
 0x3e8   : > { %v1307_v21 = vmax.f32 %v1305_v62, %v1306_v10  ;;  %v1319_v22 = vmax.f32 %v1317_v63, %v1318_v11  ;;  %2537 = vmatpush3.bf16.msra.mxu0 %v2536_v51  ;;  %2569 = vmatpush3.bf16.msra.mxu1 %v2568_v58  ;;  %v2965_v51 = vmov 0.0|0.0   ;;  %v1795_v58 = vld [vmem:[#allocation11 + $0x28] sm:$0xff]  ;;  %v2588_v62 = vpack.c.bf16 %v1797_v61, %v1796_v60  ;;  %v1798_v63 = vld [vmem:[#allocation11 + $0x40] sm:$0xff]  ;;  %v1805_v10 = vld [vmem:[#allocation11 + $0x78] sm:$0xff] }
 0x3e9   : > { %v1302_v44 = vrot.slane %v1301_v17, 1  ;;  %v1314_v27 = vrot.slane %v1313_v18, 1  ;;  %2539 = vmatprep.subr.bf16.mxu0 %v2538_v0  ;;  %2571 = vmatprep.subr.bf16.mxu1 %v2570_v7  ;;  %v2585_v59 = vpack.c.bf16 %v1795_v58, %v1794_v56  ;;  %v1799_v0 = vld [vmem:[#allocation11 + $0x48] sm:$0xff]  ;;  %v1802_v6 = vld [vmem:[#allocation11 + $0x60] sm:$0xff]  ;;  %v2600_v11 = vpack.c.bf16 %v1805_v10, %v1804_v9 }
 0x3ea   : > { %v1308_v31 = vrot.slane %v1307_v21, 1  ;;  %v1320_v32 = vrot.slane %v1319_v22, 1  ;;  %v2591_v2 = vpack.c.bf16 %v1799_v0, %v1798_v63  ;;  %v1803_v7 = vld [vmem:[#allocation11 + $0x68] sm:$0xff] }
 0x3eb   : > { %v1303_v35 = vmax.f32 %v1301_v17, %v1302_v44  ;;  %v1315_v36 = vmax.f32 %v1313_v18, %v1314_v27  ;;  %v2597_v8 = vpack.c.bf16 %v1803_v7, %v1802_v6 }
 0x3ec   : > { %2541 = vmatpush3.bf16.msra.mxu0 %v2540_v12  ;;  %2573 = vmatpush3.bf16.msra.mxu1 %v2572_v19  ;;  %v1309_v38 = vmax.f32 %v1307_v21, %v1308_v31  ;;  %v1321_v39 = vmax.f32 %v1319_v22, %v1320_v32 }
 0x3ed   : > { %2543 = vmatprep.subr.bf16.mxu0 %v2542_v28  ;;  %2575 = vmatprep.subr.bf16.mxu1 %v2574_v29  ;;  %v1368_v40 = vadd.f32 %v1343_v20, %v1303_v35  ;;  %v1370_v41 = vadd.f32 %v1351_v25, %v1315_v36  ;;  %v1806_v29 = vld [vmem:[%s3418_s23] sm:$0x1] }
 0x3ee   : > { %v1369_v42 = vadd.f32 %v1347_v33, %v1309_v38  ;;  %v1371_v43 = vadd.f32 %v1355_v34, %v1321_v39 }
 0x3ef   : > { %v1376_v47 = vmax.f32 %v1368_v40, 0.0  ;;  %v1378_v1 = vmax.f32 %v1370_v41, 0.0 }
 0x3f0   : > { %2545 = vmatpush3.bf16.msra.mxu0 %v2544_v57  ;;  %2577 = vmatpush3.bf16.msra.mxu1 %v2576_v37  ;;  %v1377_v45 = vmax.f32 %v1369_v42, 0.0  ;;  %v1379_v46 = vmax.f32 %v1371_v43, 0.0 }
 0x3f1   : > { %2578 = vmatprep.subr.bf16.mxu0 %v2965_v51 }
 0x3f2   : > { %1713 = vmatprep.mubr.f32.mxu0 %v1377_v45  ;;  %1783 = vmatprep.mubr.f32.mxu1 %v1379_v46 }
 0x3f3   : > { %1714 = vmatmul.mubr.f32.vlgmr.msra.gmra.mrb[10].mxu0 %v1376_v47  ;;  %1784 = vmatmul.mubr.f32.vlgmr.msra.gmra.mrb[14].mxu1 %v1378_v1 }
 0x3f4   : > { %2580 = vmatpush3.bf16.msra.mxu0 %v2579_v53  ;;  %2287 = vmatprep.mubr.msk.f32.mxu0 %vm2966_vm1, %v2964_v26 }
 0x3f5   : > { %2581 = vmatprep.subr.bf16.mxu0 %v2965_v51 }
 0x3f8   : > { %2583 = vmatpush3.bf16.msra.mxu0 %v2582_v55 }
 0x3f9   : > { %2584 = vmatprep.subr.bf16.mxu0 %v2965_v51 }
 0x3fc   : > { %2586 = vmatpush3.bf16.msra.mxu0 %v2585_v59 }
 0x3fd   : > { %2587 = vmatprep.subr.bf16.mxu0 %v2965_v51 }
 0x400   : > { %2589 = vmatpush3.bf16.msra.mxu0 %v2588_v62 }
 0x401   : > { %2590 = vmatprep.subr.bf16.mxu0 %v2965_v51 }
 0x404   : > { %2592 = vmatpush3.bf16.msra.mxu0 %v2591_v2 }
 0x405   : > { %2593 = vmatprep.subr.bf16.mxu0 %v2965_v51 }
 0x408   : > { %2595 = vmatpush3.bf16.msra.mxu0 %v2594_v5 }
 0x409   : > { %2596 = vmatprep.subr.bf16.mxu0 %v2965_v51 }
 0x40c   : > { %2598 = vmatpush3.bf16.msra.mxu0 %v2597_v8 }
 0x40d   : > { %2599 = vmatprep.subr.bf16.mxu0 %v2965_v51 }
 0x410   : > { %2601 = vmatpush3.bf16.msra.mxu0 %v2600_v11 }
 0x4a6   : > { %v2092_v12 = vpop.f32.mrb[8].mxu0  ;;  %v2127_v13 = vpop.f32.mrb[12].mxu1 }
 0x4a7   : > { %v2093_v15 = vpop.f32.mrb[9].mxu0  ;;  %v2128_v16 = vpop.f32.mrb[13].mxu1 }
 0x4a8   : > { %v2094_v17 = vadd.f32 %v2093_v15, %v2092_v12  ;;  %v2129_v18 = vadd.f32 %v2128_v16, %v2127_v13 }
 0x4aa   : > { %v1576_v19 = vadd.f32 %v2094_v17, %v1508_v14 }
 0x4ac   : > { %v1646_v20 = vadd.f32 %v2129_v18, %v1576_v19 }
 0x4c6   : > { %v2162_v21 = vpop.f32.mrb[10].mxu0  ;;  %v2197_v22 = vpop.f32.mrb[14].mxu1 }
 0x4c7   : > { %v2163_v23 = vpop.f32.mrb[11].mxu0  ;;  %v2198_v24 = vpop.f32.mrb[15].mxu1 }
 0x4c8   : > { %v2164_v25 = vadd.f32 %v2163_v23, %v2162_v21  ;;  %v2199_v26 = vadd.f32 %v2198_v24, %v2197_v22 }
 0x4ca   : > { %v1716_v44 = vadd.f32 %v2164_v25, %v1646_v20 }
 0x4cc   : > { %v1786_v27 = vadd.f32 %v2199_v26, %v1716_v44 }
 0x4ce   : > { %v1789_v28 = vmax.f32 %v1786_v27, 0.0 }
 0x4d0   : > { %2288 = vmatmul.mubr.f32.vlgmr.msra.gmra.mrb[12].mxu0 %v1789_v28 }
 0x5a3   : > { %v1873_v52 = vpop.f32.mrb[12].mxu0 }
 0x5a4   : > { %v1874_v30 = vadd.f32 %v1873_v52, %v1806_v29  ;;  %v2289_v31 = vpop.f32.mrb[13].mxu0 }
 0x5a6   : > { %1877 = vst [vmem:[%s528_s13] sm:$0x1] %v1874_v30 }
 0x5a7   : > { %2874 = shalt.err (!%p2871_p6)
}
 0x5a8   : > { %s2875_s27 = scalar_lea.hbm %s3317_s29, 16  ;;  %s2879_s24 = scalar_lea.hbm %s3419_s17, 32 }
 0x5a9   : > { %p2876_p7 = scmp.ne.s32.totalorder %s3317_s29, %s2875_s27  ;;  %p2880_p4 = scmp.lt.u32.totalorder %s3317_s29, %s3419_s17 }
 0x5aa   : > { %p2881_p1 = scmp.lt.u32.totalorder %s2879_s24, %s2875_s27  ;;  %p2883_p8 = scmp.lt.u32.totalorder %s2875_s27, %s3317_s29 }
 0x5ab   : > { %p2877_p9 = pnand %p2876_p7, %p3420_p10 }
 0x5ac   : > { %p2882_p13 = por %p2881_p1, %p2880_p4 }
 0x5ad   : > { %p2878_p12 = pneg %p2877_p9 }
 0x5ae   : > { %p2884_p11 = por %p2883_p8, %p2882_p13 }
 0x5b0   : > { %p2885_p0 = pnand %p2884_p11, %p2878_p12 }
 0x5b2   : > { %2888 = shalt.err (!%p2885_p0)
}
 0x5b3   : > { %2622 = dma.vmem_to_hbm [thread:$0]  (%p3420_p10), %s3319_s30, 16, %s3317_s29, %s1879_s15  }
 0x5b4 PF: > { %s3421_s23 = sld [smem:[#allocation21_spill]]  ;;  %s3422_s26 = sld [smem:[#allocation17_spill]] }
 0x5b5   : > { %s3423_s13 = sld [smem:[#allocation24_spill]] }
 0x5ba   : > { %p2654_p2 = scmp.ge.s32.totalorder %s3421_s23, 2  ;;  %s1903_s25 = sand.u32 1, %s3422_s26  }
 0x5bb   : > { %p3424_p3 = scmp.ne.s32.totalorder %s3423_s13, 0  ;;  %s1904_s14 = scalar_lea.sflag [#allocation5], %s1903_s25 }
 0x5bd   : > { %p2641_p5 = pnand %p2654_p2, %p3424_p3 }
 0x5bf   : > { %2926 = dma.done.wait (!%p2641_p5), %s1904_s14, 16  }
 0x5c0   : > { %2928 = vsyncadd (!%p2641_p5), %s1904_s14, 4294967280  ;;  %s29_s30 = sadd.s32 1, %s3421_s23   ;;  %s3425_s25 = sld [smem:[#allocation18_spill]] }
 0x5c1   : > { %p26_p6 = scmp.ge.s32.totalorder %s29_s30, 4   ;;  %s3426_s26 = sld [smem:[#allocation19_spill]] }
 0x5c2   : > { %s3427_s27 = sld [smem:[#allocation25_spill]]  ;;  %s3428_s28 = sld [smem:[#allocation20_spill]] }
 0x5c3   : > { %s3429_s29 = sld [smem:[#allocation22_spill]]  ;;  %28 = sbr.rel (!%p26_p6) target bundleno = 11 (0xb), region = 136 }
 0x5ca   :  { %1908 = vsyncpa [#allocation4], 1 }
 0x5cb   :  { %1910 = vsyncpa [#allocation4 + $0x1], 1 }
 0x5cc   :  { %1911 = vsyncpa [#allocation7], 1 }
 0x5cd   :  { %1912 = vsyncpa [#allocation10], 1 }
 0x5ce   :  { %1913 = vsyncpa [#allocation5], 1 }
 0x5cf   :  { %1915 = vsyncpa [#allocation5 + $0x1], 1 }

</bundles_post_ra>
